<compile_context>
chip_gen: v5e
topology: v5e:2x2
jax: 0.10.0
libtpu: 0.0.40
codegen_flags: <defaults>
</compile_context>

<pallas_src>
import jax
import jax.numpy as jnp
from jax import lax
from jax.experimental import pallas as pl
from jax.experimental.pallas import tpu as pltpu

# ---------------- model config (small, deterministic) ----------------
VOCAB = 40
EMBED = 16
HIDDEN = 32
NUM_LAYERS = 2
BATCH = 8   # 8 rows == one sublane tile -> every per-timestep slab is sublane-aligned
SEQ = 8
# TODO(synk): nn.GRU dropout between layers is a train-mode-only op; eval semantics (identity) implemented.


def seq2seq_decoder_kernel(
    x_ref,       # (S*B, E)   embedded tokens, time-major rows (row = t*B + b)
    ctx_ref,     # (B, H)     encoder context = state[-1]
    h0_ref,      # (L, B, H)  initial hidden state
    wih0x_ref,   # (E, 3H)    layer-0 W_ih, input columns, pre-transposed
    wih0c_ref,   # (H, 3H)    layer-0 W_ih, context columns, pre-transposed
    whh0_ref,    # (H, 3H)    layer-0 W_hh, pre-transposed
    b0_ref,      # (1, 3H)    b_ih0 + [b_hh0_r, b_hh0_z, 0]
    bhh0n_ref,   # (1, H)     b_hh0 n-gate part
    wih1_ref,    # (H, 3H)    layer-1 W_ih, pre-transposed
    whh1_ref,    # (H, 3H)    layer-1 W_hh, pre-transposed
    b1_ref,      # (1, 3H)    b_ih1 + [b_hh1_r, b_hh1_z, 0]
    bhh1n_ref,   # (1, H)     b_hh1 n-gate part
    wd_ref,      # (H, V)     dense weight, pre-transposed
    bd_ref,      # (1, V)     dense bias
    out_ref,     # (S*B, V)   logits, time-major rows
    hT_ref,      # (L, B, H)  final hidden state
):
    H = HIDDEN
    B = BATCH
    S = SEQ

    whh0 = whh0_ref[...]
    whh1 = whh1_ref[...]
    wih1 = wih1_ref[...]
    b1 = b1_ref[...]
    bhh0n = bhh0n_ref[...]
    bhh1n = bhh1n_ref[...]

    # Batched input-side preactivations for layer 0 over all timesteps: (S*B, 3H).
    gi0 = jnp.dot(x_ref[...], wih0x_ref[...], preferred_element_type=jnp.float32)
    # Context + folded-bias contribution, constant across time: (B, 3H).
    gic = jnp.dot(ctx_ref[...], wih0c_ref[...],
                  preferred_element_type=jnp.float32) + b0_ref[...]

    def gru_step(gi_t, h, whh, bhh_n):
        # gi_t already contains W_ih x + b_ih + b_hh[r,z]; only the hidden-side matmul
        # (and the n-gate b_hh) remains on the serial chain.
        gh = jnp.dot(h, whh, preferred_element_type=jnp.float32)        # (B, 3H)
        r = jax.nn.sigmoid(gi_t[:, :H] + gh[:, :H])
        z = jax.nn.sigmoid(gi_t[:, H:2 * H] + gh[:, H:2 * H])
        n = jnp.tanh(gi_t[:, 2 * H:] + r * (gh[:, 2 * H:] + bhh_n))
        return (1.0 - z) * n + z * h

    # ---- layer 0 recurrence: fully unrolled (S is small & static) ----
    h0 = h0_ref[0]
    ys = []
    for t in range(S):
        gi_t = gi0[t * B:(t + 1) * B, :] + gic      # sublane-aligned slice (B == 8)
        h0 = gru_step(gi_t, h0, whh0, bhh0n)
        ys.append(h0)
    hT_ref[0] = h0

    # ---- layer 1 recurrence: fully unrolled. gi is computed per step from ys[t], so
    # layer-1 step t only depends on layer-0 up to step t; with the whole kernel being
    # one basic block the scheduler overlaps the two layers' MXU chains. ----
    h1 = h0_ref[1]
    zs = []
    for t in range(S):
        gi_t = jnp.dot(ys[t], wih1, preferred_element_type=jnp.float32) + b1
        h1 = gru_step(gi_t, h1, whh1, bhh1n)
        zs.append(h1)
    hT_ref[1] = h1

    # ---- batched dense projection + single dense store ----
    y1 = jnp.concatenate(zs, axis=0)                                    # (S*B, H)
    out_ref[...] = jnp.dot(y1, wd_ref[...],
                           preferred_element_type=jnp.float32) + bd_ref[...]


def _vmem_spec():
    return pl.BlockSpec(memory_space=pltpu.MemorySpace.VMEM)


def seq2seq_decoder_forward(X_tokens, state, params):
    """X_tokens: (B, S) int32 token ids. state: (L, B, H) float32.
    Returns (logits (B, S, V), new_state (L, B, H))."""
    B, S = X_tokens.shape
    H = HIDDEN

    # Embedding gather + time-major flatten (glue, stays in plain JAX).
    x_emb = params["embedding"][X_tokens]                              # (B, S, E)
    x_flat = jnp.transpose(x_emb, (1, 0, 2)).reshape(S * B, EMBED)     # (S*B, E)
    ctx = state[-1]                                                    # (B, H)

    # Pre-transpose weights; split W_ih0 into input/context column blocks; fold the
    # r/z halves of b_hh into the input-side bias (n-gate b_hh stays separate).
    w_ih0 = params["w_ih0"]                                            # (3H, E+H)
    w_ih0_x = w_ih0[:, :EMBED].T                                       # (E, 3H)
    w_ih0_c = w_ih0[:, EMBED:].T                                       # (H, 3H)
    w_hh0_t = params["w_hh0"].T                                        # (H, 3H)
    b_hh0 = params["b_hh0"]
    b0 = params["b_ih0"] + b_hh0.at[:, 2 * H:].set(0.0)                # (1, 3H)
    b_hh0_n = b_hh0[:, 2 * H:]                                         # (1, H)

    w_ih1_t = params["w_ih1"].T                                        # (H, 3H)
    w_hh1_t = params["w_hh1"].T                                        # (H, 3H)
    b_hh1 = params["b_hh1"]
    b1 = params["b_ih1"] + b_hh1.at[:, 2 * H:].set(0.0)
    b_hh1_n = b_hh1[:, 2 * H:]

    w_d_t = params["w_dense"].T                                        # (H, V)

    out_shapes = (
        jax.ShapeDtypeStruct((S * B, VOCAB), jnp.float32),
        jax.ShapeDtypeStruct((NUM_LAYERS, B, HIDDEN), jnp.float32),
    )
    logits_flat, new_state = pl.pallas_call(
        seq2seq_decoder_kernel,
        out_shape=out_shapes,
        in_specs=[_vmem_spec()] * 14,
        out_specs=(_vmem_spec(), _vmem_spec()),
    )(
        x_flat, ctx, state,
        w_ih0_x, w_ih0_c, w_hh0_t, b0, b_hh0_n,
        w_ih1_t, w_hh1_t, b1, b_hh1_n,
        w_d_t, params["b_dense"],
    )
    logits = logits_flat.reshape(S, B, VOCAB).transpose(1, 0, 2)       # (B, S, V)
    return logits, new_state


# ---------------- pure-JAX reference (PyTorch semantics) ----------------
def _gru_cell_ref(x, h, w_ih, w_hh, b_ih, b_hh, H):
    gi = jnp.dot(x, w_ih.T) + b_ih
    gh = jnp.dot(h, w_hh.T) + b_hh
    i_r, i_z, i_n = gi[:, :H], gi[:, H:2 * H], gi[:, 2 * H:]
    h_r, h_z, h_n = gh[:, :H], gh[:, H:2 * H], gh[:, 2 * H:]
    r = jax.nn.sigmoid(i_r + h_r)
    z = jax.nn.sigmoid(i_z + h_z)
    n = jnp.tanh(i_n + r * h_n)
    return (1.0 - z) * n + z * h


def _reference_forward(X_tokens, state, params):
    B, S = X_tokens.shape
    x = jnp.transpose(params["embedding"][X_tokens], (1, 0, 2))        # (S, B, E)
    context = jnp.broadcast_to(state[-1][None, :, :], (S, B, HIDDEN))
    xc = jnp.concatenate([x, context], axis=2)

    def run_layer(inp, h0, w_ih, w_hh, b_ih, b_hh):
        def step(h, x_t):
            h_new = _gru_cell_ref(x_t, h, w_ih, w_hh, b_ih, b_hh, HIDDEN)
            return h_new, h_new
        h_last, ys = lax.scan(step, h0, inp)
        return ys, h_last

    y0, h0f = run_layer(xc, state[0], params["w_ih0"], params["w_hh0"],
                        params["b_ih0"], params["b_hh0"])
    y1, h1f = run_layer(y0, state[1], params["w_ih1"], params["w_hh1"],
                        params["b_ih1"], params["b_hh1"])
    logits = jnp.einsum("sbh,vh->sbv", y1, params["w_dense"]) + params["b_dense"]
    return jnp.transpose(logits, (1, 0, 2)), jnp.stack([h0f, h1f], axis=0)


def make_params(key):
    ks = jax.random.split(key, 12)
    s = 0.1
    return {
        "embedding": s * jax.random.normal(ks[0], (VOCAB, EMBED), jnp.float32),
        # layer 0: input dim = EMBED + HIDDEN
        "w_ih0": s * jax.random.normal(ks[1], (3 * HIDDEN, EMBED + HIDDEN), jnp.float32),
        "w_hh0": s * jax.random.normal(ks[2], (3 * HIDDEN, HIDDEN), jnp.float32),
        "b_ih0": s * jax.random.normal(ks[3], (1, 3 * HIDDEN), jnp.float32),
        "b_hh0": s * jax.random.normal(ks[4], (1, 3 * HIDDEN), jnp.float32),
        # layer 1: input dim = HIDDEN
        "w_ih1": s * jax.random.normal(ks[5], (3 * HIDDEN, HIDDEN), jnp.float32),
        "w_hh1": s * jax.random.normal(ks[6], (3 * HIDDEN, HIDDEN), jnp.float32),
        "b_ih1": s * jax.random.normal(ks[7], (1, 3 * HIDDEN), jnp.float32),
        "b_hh1": s * jax.random.normal(ks[8], (1, 3 * HIDDEN), jnp.float32),
        # dense: hidden -> vocab
        "w_dense": s * jax.random.normal(ks[9], (VOCAB, HIDDEN), jnp.float32),
        "b_dense": s * jax.random.normal(ks[10], (1, VOCAB), jnp.float32),
    }


if __name__ == "__main__":
    key = jax.random.PRNGKey(0)
    k_par, k_tok, k_state = jax.random.split(key, 3)

    params = make_params(k_par)
    X = jax.random.randint(k_tok, (BATCH, SEQ), 0, VOCAB, dtype=jnp.int32)
    # init_state(enc_outputs) == enc_outputs[1]: encoder final hidden state (L, B, H)
    state = 0.1 * jax.random.normal(k_state, (NUM_LAYERS, BATCH, HIDDEN), jnp.float32)

    logits, new_state = jax.jit(seq2seq_decoder_forward)(X, state, params)
    jax.block_until_ready((logits, new_state))

    ref_logits, ref_state = _reference_forward(X, state, params)
    assert logits.shape == (BATCH, SEQ, VOCAB)
    assert new_state.shape == (NUM_LAYERS, BATCH, HIDDEN)
    assert jnp.allclose(logits, ref_logits, atol=1e-4, rtol=1e-4)
    assert jnp.allclose(new_state, ref_state, atol=1e-4, rtol=1e-4)

    print("KERNEL_OK")
</pallas_src>

<mosaic_0001>
module attributes {stable_mosaic.version = 11 : i64} {
  func.func @seq2seq_decoder_kernel(%arg0: memref<64x16xf32, #tpu.memory_space<vmem>>, %arg1: memref<8x32xf32, #tpu.memory_space<vmem>>, %arg2: memref<2x8x32xf32, #tpu.memory_space<vmem>>, %arg3: memref<16x96xf32, #tpu.memory_space<vmem>>, %arg4: memref<32x96xf32, #tpu.memory_space<vmem>>, %arg5: memref<32x96xf32, #tpu.memory_space<vmem>>, %arg6: memref<1x96xf32, #tpu.memory_space<vmem>>, %arg7: memref<1x32xf32, #tpu.memory_space<vmem>>, %arg8: memref<32x96xf32, #tpu.memory_space<vmem>>, %arg9: memref<32x96xf32, #tpu.memory_space<vmem>>, %arg10: memref<1x96xf32, #tpu.memory_space<vmem>>, %arg11: memref<1x32xf32, #tpu.memory_space<vmem>>, %arg12: memref<32x40xf32, #tpu.memory_space<vmem>>, %arg13: memref<1x40xf32, #tpu.memory_space<vmem>>, %arg14: memref<64x40xf32, #tpu.memory_space<vmem>>, %arg15: memref<2x8x32xf32, #tpu.memory_space<vmem>>) attributes {dimension_semantics = [], scalar_prefetch = 0 : i64, scratch_operands = 0 : i64, tpu.core_type = #tpu.core_type<tc>} {
    %c0 = arith.constant 0 : index
    %c0_0 = arith.constant 0 : index
    %0 = vector.load %arg5[%c0, %c0_0] : memref<32x96xf32, #tpu.memory_space<vmem>>, vector<32x96xf32>
    %c0_1 = arith.constant 0 : index
    %c0_2 = arith.constant 0 : index
    %1 = vector.load %arg9[%c0_1, %c0_2] : memref<32x96xf32, #tpu.memory_space<vmem>>, vector<32x96xf32>
    %c0_3 = arith.constant 0 : index
    %c0_4 = arith.constant 0 : index
    %2 = vector.load %arg8[%c0_3, %c0_4] : memref<32x96xf32, #tpu.memory_space<vmem>>, vector<32x96xf32>
    %c0_5 = arith.constant 0 : index
    %c0_6 = arith.constant 0 : index
    %3 = vector.load %arg10[%c0_5, %c0_6] : memref<1x96xf32, #tpu.memory_space<vmem>>, vector<1x96xf32>
    %c0_7 = arith.constant 0 : index
    %c0_8 = arith.constant 0 : index
    %4 = vector.load %arg7[%c0_7, %c0_8] : memref<1x32xf32, #tpu.memory_space<vmem>>, vector<1x32xf32>
    %c0_9 = arith.constant 0 : index
    %c0_10 = arith.constant 0 : index
    %5 = vector.load %arg11[%c0_9, %c0_10] : memref<1x32xf32, #tpu.memory_space<vmem>>, vector<1x32xf32>
    %c0_11 = arith.constant 0 : index
    %c0_12 = arith.constant 0 : index
    %6 = vector.load %arg0[%c0_11, %c0_12] : memref<64x16xf32, #tpu.memory_space<vmem>>, vector<64x16xf32>
    %c0_13 = arith.constant 0 : index
    %c0_14 = arith.constant 0 : index
    %7 = vector.load %arg3[%c0_13, %c0_14] : memref<16x96xf32, #tpu.memory_space<vmem>>, vector<16x96xf32>
    %cst = arith.constant dense<0.000000e+00> : vector<64x96xf32>
    %8 = tpu.matmul %6, %7, %cst {dimension_numbers = #tpu.dot_dimension_numbers<[1], [0], [0], [1], [0, 0, 1, 1], [], []>} : vector<64x16xf32>, vector<16x96xf32>, vector<64x96xf32> -> vector<64x96xf32>
    %c0_15 = arith.constant 0 : index
    %c0_16 = arith.constant 0 : index
    %9 = vector.load %arg1[%c0_15, %c0_16] : memref<8x32xf32, #tpu.memory_space<vmem>>, vector<8x32xf32>
    %c0_17 = arith.constant 0 : index
    %c0_18 = arith.constant 0 : index
    %10 = vector.load %arg4[%c0_17, %c0_18] : memref<32x96xf32, #tpu.memory_space<vmem>>, vector<32x96xf32>
    %cst_19 = arith.constant dense<0.000000e+00> : vector<8x96xf32>
    %11 = tpu.matmul %9, %10, %cst_19 {dimension_numbers = #tpu.dot_dimension_numbers<[1], [0], [0], [1], [0, 0, 1, 1], [], []>} : vector<8x32xf32>, vector<32x96xf32>, vector<8x96xf32> -> vector<8x96xf32>
    %c0_20 = arith.constant 0 : index
    %c0_21 = arith.constant 0 : index
    %12 = vector.load %arg6[%c0_20, %c0_21] : memref<1x96xf32, #tpu.memory_space<vmem>>, vector<1x96xf32>
    %13 = vector.broadcast %12 : vector<1x96xf32> to vector<8x96xf32>
    %14 = arith.addf %11, %13 : vector<8x96xf32>
    %c0_22 = arith.constant 0 : index
    %c0_23 = arith.constant 0 : index
    %c0_24 = arith.constant 0 : index
    %15 = vector.load %arg2[%c0_22, %c0_23, %c0_24] : memref<2x8x32xf32, #tpu.memory_space<vmem>>, vector<1x8x32xf32>
    %16 = vector.shape_cast %15 : vector<1x8x32xf32> to vector<8x32xf32>
    %17 = vector.extract_strided_slice %8 {offsets = [0, 0], sizes = [8, 96], strides = [1, 1]} : vector<64x96xf32> to vector<8x96xf32>
    %18 = arith.addf %17, %14 : vector<8x96xf32>
    %cst_25 = arith.constant dense<0.000000e+00> : vector<8x96xf32>
    %19 = tpu.matmul %16, %0, %cst_25 {dimension_numbers = #tpu.dot_dimension_numbers<[1], [0], [0], [1], [0, 0, 1, 1], [], []>} : vector<8x32xf32>, vector<32x96xf32>, vector<8x96xf32> -> vector<8x96xf32>
    %20 = vector.extract_strided_slice %18 {offsets = [0, 0], sizes = [8, 32], strides = [1, 1]} : vector<8x96xf32> to vector<8x32xf32>
    %21 = vector.extract_strided_slice %19 {offsets = [0, 0], sizes = [8, 32], strides = [1, 1]} : vector<8x96xf32> to vector<8x32xf32>
    %22 = arith.addf %20, %21 : vector<8x32xf32>
    %23 = arith.negf %22 : vector<8x32xf32>
    %24 = math.exp %23 : vector<8x32xf32>
    %cst_26 = arith.constant 1.000000e+00 : f32
    %25 = vector.broadcast %cst_26 : f32 to vector<8x32xf32>
    %26 = arith.addf %25, %24 : vector<8x32xf32>
    %27 = arith.divf %25, %26 : vector<8x32xf32>
    %28 = vector.extract_strided_slice %18 {offsets = [0, 32], sizes = [8, 32], strides = [1, 1]} : vector<8x96xf32> to vector<8x32xf32>
    %29 = vector.extract_strided_slice %19 {offsets = [0, 32], sizes = [8, 32], strides = [1, 1]} : vector<8x96xf32> to vector<8x32xf32>
    %30 = arith.addf %28, %29 : vector<8x32xf32>
    %31 = arith.negf %30 : vector<8x32xf32>
    %32 = math.exp %31 : vector<8x32xf32>
    %cst_27 = arith.constant 1.000000e+00 : f32
    %33 = vector.broadcast %cst_27 : f32 to vector<8x32xf32>
    %34 = arith.addf %33, %32 : vector<8x32xf32>
    %35 = arith.divf %33, %34 : vector<8x32xf32>
    %36 = vector.extract_strided_slice %18 {offsets = [0, 64], sizes = [8, 32], strides = [1, 1]} : vector<8x96xf32> to vector<8x32xf32>
    %37 = vector.extract_strided_slice %19 {offsets = [0, 64], sizes = [8, 32], strides = [1, 1]} : vector<8x96xf32> to vector<8x32xf32>
    %38 = vector.broadcast %4 : vector<1x32xf32> to vector<8x32xf32>
    %39 = arith.addf %37, %38 : vector<8x32xf32>
    %40 = arith.mulf %27, %39 : vector<8x32xf32>
    %41 = arith.addf %36, %40 : vector<8x32xf32>
    %42 = math.tanh %41 : vector<8x32xf32>
    %cst_28 = arith.constant 1.000000e+00 : f32
    %43 = vector.broadcast %cst_28 : f32 to vector<8x32xf32>
    %44 = arith.subf %43, %35 : vector<8x32xf32>
    %45 = arith.mulf %44, %42 : vector<8x32xf32>
    %46 = arith.mulf %35, %16 : vector<8x32xf32>
    %47 = arith.addf %45, %46 : vector<8x32xf32>
    %48 = vector.extract_strided_slice %8 {offsets = [8, 0], sizes = [8, 96], strides = [1, 1]} : vector<64x96xf32> to vector<8x96xf32>
    %49 = arith.addf %48, %14 : vector<8x96xf32>
    %cst_29 = arith.constant dense<0.000000e+00> : vector<8x96xf32>
    %50 = tpu.matmul %47, %0, %cst_29 {dimension_numbers = #tpu.dot_dimension_numbers<[1], [0], [0], [1], [0, 0, 1, 1], [], []>} : vector<8x32xf32>, vector<32x96xf32>, vector<8x96xf32> -> vector<8x96xf32>
    %51 = vector.extract_strided_slice %49 {offsets = [0, 0], sizes = [8, 32], strides = [1, 1]} : vector<8x96xf32> to vector<8x32xf32>
    %52 = vector.extract_strided_slice %50 {offsets = [0, 0], sizes = [8, 32], strides = [1, 1]} : vector<8x96xf32> to vector<8x32xf32>
    %53 = arith.addf %51, %52 : vector<8x32xf32>
    %54 = arith.negf %53 : vector<8x32xf32>
    %55 = math.exp %54 : vector<8x32xf32>
    %cst_30 = arith.constant 1.000000e+00 : f32
    %56 = vector.broadcast %cst_30 : f32 to vector<8x32xf32>
    %57 = arith.addf %56, %55 : vector<8x32xf32>
    %58 = arith.divf %56, %57 : vector<8x32xf32>
    %59 = vector.extract_strided_slice %49 {offsets = [0, 32], sizes = [8, 32], strides = [1, 1]} : vector<8x96xf32> to vector<8x32xf32>
    %60 = vector.extract_strided_slice %50 {offsets = [0, 32], sizes = [8, 32], strides = [1, 1]} : vector<8x96xf32> to vector<8x32xf32>
    %61 = arith.addf %59, %60 : vector<8x32xf32>
    %62 = arith.negf %61 : vector<8x32xf32>
    %63 = math.exp %62 : vector<8x32xf32>
    %cst_31 = arith.constant 1.000000e+00 : f32
    %64 = vector.broadcast %cst_31 : f32 to vector<8x32xf32>
    %65 = arith.addf %64, %63 : vector<8x32xf32>
    %66 = arith.divf %64, %65 : vector<8x32xf32>
    %67 = vector.extract_strided_slice %49 {offsets = [0, 64], sizes = [8, 32], strides = [1, 1]} : vector<8x96xf32> to vector<8x32xf32>
    %68 = vector.extract_strided_slice %50 {offsets = [0, 64], sizes = [8, 32], strides = [1, 1]} : vector<8x96xf32> to vector<8x32xf32>
    %69 = vector.broadcast %4 : vector<1x32xf32> to vector<8x32xf32>
    %70 = arith.addf %68, %69 : vector<8x32xf32>
    %71 = arith.mulf %58, %70 : vector<8x32xf32>
    %72 = arith.addf %67, %71 : vector<8x32xf32>
    %73 = math.tanh %72 : vector<8x32xf32>
    %cst_32 = arith.constant 1.000000e+00 : f32
    %74 = vector.broadcast %cst_32 : f32 to vector<8x32xf32>
    %75 = arith.subf %74, %66 : vector<8x32xf32>
    %76 = arith.mulf %75, %73 : vector<8x32xf32>
    %77 = arith.mulf %66, %47 : vector<8x32xf32>
    %78 = arith.addf %76, %77 : vector<8x32xf32>
    %79 = vector.extract_strided_slice %8 {offsets = [16, 0], sizes = [8, 96], strides = [1, 1]} : vector<64x96xf32> to vector<8x96xf32>
    %80 = arith.addf %79, %14 : vector<8x96xf32>
    %cst_33 = arith.constant dense<0.000000e+00> : vector<8x96xf32>
    %81 = tpu.matmul %78, %0, %cst_33 {dimension_numbers = #tpu.dot_dimension_numbers<[1], [0], [0], [1], [0, 0, 1, 1], [], []>} : vector<8x32xf32>, vector<32x96xf32>, vector<8x96xf32> -> vector<8x96xf32>
    %82 = vector.extract_strided_slice %80 {offsets = [0, 0], sizes = [8, 32], strides = [1, 1]} : vector<8x96xf32> to vector<8x32xf32>
    %83 = vector.extract_strided_slice %81 {offsets = [0, 0], sizes = [8, 32], strides = [1, 1]} : vector<8x96xf32> to vector<8x32xf32>
    %84 = arith.addf %82, %83 : vector<8x32xf32>
    %85 = arith.negf %84 : vector<8x32xf32>
    %86 = math.exp %85 : vector<8x32xf32>
    %cst_34 = arith.constant 1.000000e+00 : f32
    %87 = vector.broadcast %cst_34 : f32 to vector<8x32xf32>
    %88 = arith.addf %87, %86 : vector<8x32xf32>
    %89 = arith.divf %87, %88 : vector<8x32xf32>
    %90 = vector.extract_strided_slice %80 {offsets = [0, 32], sizes = [8, 32], strides = [1, 1]} : vector<8x96xf32> to vector<8x32xf32>
    %91 = vector.extract_strided_slice %81 {offsets = [0, 32], sizes = [8, 32], strides = [1, 1]} : vector<8x96xf32> to vector<8x32xf32>
    %92 = arith.addf %90, %91 : vector<8x32xf32>
    %93 = arith.negf %92 : vector<8x32xf32>
    %94 = math.exp %93 : vector<8x32xf32>
    %cst_35 = arith.constant 1.000000e+00 : f32
    %95 = vector.broadcast %cst_35 : f32 to vector<8x32xf32>
    %96 = arith.addf %95, %94 : vector<8x32xf32>
    %97 = arith.divf %95, %96 : vector<8x32xf32>
    %98 = vector.extract_strided_slice %80 {offsets = [0, 64], sizes = [8, 32], strides = [1, 1]} : vector<8x96xf32> to vector<8x32xf32>
    %99 = vector.extract_strided_slice %81 {offsets = [0, 64], sizes = [8, 32], strides = [1, 1]} : vector<8x96xf32> to vector<8x32xf32>
    %100 = vector.broadcast %4 : vector<1x32xf32> to vector<8x32xf32>
    %101 = arith.addf %99, %100 : vector<8x32xf32>
    %102 = arith.mulf %89, %101 : vector<8x32xf32>
    %103 = arith.addf %98, %102 : vector<8x32xf32>
    %104 = math.tanh %103 : vector<8x32xf32>
    %cst_36 = arith.constant 1.000000e+00 : f32
    %105 = vector.broadcast %cst_36 : f32 to vector<8x32xf32>
    %106 = arith.subf %105, %97 : vector<8x32xf32>
    %107 = arith.mulf %106, %104 : vector<8x32xf32>
    %108 = arith.mulf %97, %78 : vector<8x32xf32>
    %109 = arith.addf %107, %108 : vector<8x32xf32>
    %110 = vector.extract_strided_slice %8 {offsets = [24, 0], sizes = [8, 96], strides = [1, 1]} : vector<64x96xf32> to vector<8x96xf32>
    %111 = arith.addf %110, %14 : vector<8x96xf32>
    %cst_37 = arith.constant dense<0.000000e+00> : vector<8x96xf32>
    %112 = tpu.matmul %109, %0, %cst_37 {dimension_numbers = #tpu.dot_dimension_numbers<[1], [0], [0], [1], [0, 0, 1, 1], [], []>} : vector<8x32xf32>, vector<32x96xf32>, vector<8x96xf32> -> vector<8x96xf32>
    %113 = vector.extract_strided_slice %111 {offsets = [0, 0], sizes = [8, 32], strides = [1, 1]} : vector<8x96xf32> to vector<8x32xf32>
    %114 = vector.extract_strided_slice %112 {offsets = [0, 0], sizes = [8, 32], strides = [1, 1]} : vector<8x96xf32> to vector<8x32xf32>
    %115 = arith.addf %113, %114 : vector<8x32xf32>
    %116 = arith.negf %115 : vector<8x32xf32>
    %117 = math.exp %116 : vector<8x32xf32>
    %cst_38 = arith.constant 1.000000e+00 : f32
    %118 = vector.broadcast %cst_38 : f32 to vector<8x32xf32>
    %119 = arith.addf %118, %117 : vector<8x32xf32>
    %120 = arith.divf %118, %119 : vector<8x32xf32>
    %121 = vector.extract_strided_slice %111 {offsets = [0, 32], sizes = [8, 32], strides = [1, 1]} : vector<8x96xf32> to vector<8x32xf32>
    %122 = vector.extract_strided_slice %112 {offsets = [0, 32], sizes = [8, 32], strides = [1, 1]} : vector<8x96xf32> to vector<8x32xf32>
    %123 = arith.addf %121, %122 : vector<8x32xf32>
    %124 = arith.negf %123 : vector<8x32xf32>
    %125 = math.exp %124 : vector<8x32xf32>
    %cst_39 = arith.constant 1.000000e+00 : f32
    %126 = vector.broadcast %cst_39 : f32 to vector<8x32xf32>
    %127 = arith.addf %126, %125 : vector<8x32xf32>
    %128 = arith.divf %126, %127 : vector<8x32xf32>
    %129 = vector.extract_strided_slice %111 {offsets = [0, 64], sizes = [8, 32], strides = [1, 1]} : vector<8x96xf32> to vector<8x32xf32>
    %130 = vector.extract_strided_slice %112 {offsets = [0, 64], sizes = [8, 32], strides = [1, 1]} : vector<8x96xf32> to vector<8x32xf32>
    %131 = vector.broadcast %4 : vector<1x32xf32> to vector<8x32xf32>
    %132 = arith.addf %130, %131 : vector<8x32xf32>
    %133 = arith.mulf %120, %132 : vector<8x32xf32>
    %134 = arith.addf %129, %133 : vector<8x32xf32>
    %135 = math.tanh %134 : vector<8x32xf32>
    %cst_40 = arith.constant 1.000000e+00 : f32
    %136 = vector.broadcast %cst_40 : f32 to vector<8x32xf32>
    %137 = arith.subf %136, %128 : vector<8x32xf32>
    %138 = arith.mulf %137, %135 : vector<8x32xf32>
    %139 = arith.mulf %128, %109 : vector<8x32xf32>
    %140 = arith.addf %138, %139 : vector<8x32xf32>
    %141 = vector.extract_strided_slice %8 {offsets = [32, 0], sizes = [8, 96], strides = [1, 1]} : vector<64x96xf32> to vector<8x96xf32>
    %142 = arith.addf %141, %14 : vector<8x96xf32>
    %cst_41 = arith.constant dense<0.000000e+00> : vector<8x96xf32>
    %143 = tpu.matmul %140, %0, %cst_41 {dimension_numbers = #tpu.dot_dimension_numbers<[1], [0], [0], [1], [0, 0, 1, 1], [], []>} : vector<8x32xf32>, vector<32x96xf32>, vector<8x96xf32> -> vector<8x96xf32>
    %144 = vector.extract_strided_slice %142 {offsets = [0, 0], sizes = [8, 32], strides = [1, 1]} : vector<8x96xf32> to vector<8x32xf32>
    %145 = vector.extract_strided_slice %143 {offsets = [0, 0], sizes = [8, 32], strides = [1, 1]} : vector<8x96xf32> to vector<8x32xf32>
    %146 = arith.addf %144, %145 : vector<8x32xf32>
    %147 = arith.negf %146 : vector<8x32xf32>
    %148 = math.exp %147 : vector<8x32xf32>
    %cst_42 = arith.constant 1.000000e+00 : f32
    %149 = vector.broadcast %cst_42 : f32 to vector<8x32xf32>
    %150 = arith.addf %149, %148 : vector<8x32xf32>
    %151 = arith.divf %149, %150 : vector<8x32xf32>
    %152 = vector.extract_strided_slice %142 {offsets = [0, 32], sizes = [8, 32], strides = [1, 1]} : vector<8x96xf32> to vector<8x32xf32>
    %153 = vector.extract_strided_slice %143 {offsets = [0, 32], sizes = [8, 32], strides = [1, 1]} : vector<8x96xf32> to vector<8x32xf32>
    %154 = arith.addf %152, %153 : vector<8x32xf32>
    %155 = arith.negf %154 : vector<8x32xf32>
    %156 = math.exp %155 : vector<8x32xf32>
    %cst_43 = arith.constant 1.000000e+00 : f32
    %157 = vector.broadcast %cst_43 : f32 to vector<8x32xf32>
    %158 = arith.addf %157, %156 : vector<8x32xf32>
    %159 = arith.divf %157, %158 : vector<8x32xf32>
    %160 = vector.extract_strided_slice %142 {offsets = [0, 64], sizes = [8, 32], strides = [1, 1]} : vector<8x96xf32> to vector<8x32xf32>
    %161 = vector.extract_strided_slice %143 {offsets = [0, 64], sizes = [8, 32], strides = [1, 1]} : vector<8x96xf32> to vector<8x32xf32>
    %162 = vector.broadcast %4 : vector<1x32xf32> to vector<8x32xf32>
    %163 = arith.addf %161, %162 : vector<8x32xf32>
    %164 = arith.mulf %151, %163 : vector<8x32xf32>
    %165 = arith.addf %160, %164 : vector<8x32xf32>
    %166 = math.tanh %165 : vector<8x32xf32>
    %cst_44 = arith.constant 1.000000e+00 : f32
    %167 = vector.broadcast %cst_44 : f32 to vector<8x32xf32>
    %168 = arith.subf %167, %159 : vector<8x32xf32>
    %169 = arith.mulf %168, %166 : vector<8x32xf32>
    %170 = arith.mulf %159, %140 : vector<8x32xf32>
    %171 = arith.addf %169, %170 : vector<8x32xf32>
    %172 = vector.extract_strided_slice %8 {offsets = [40, 0], sizes = [8, 96], strides = [1, 1]} : vector<64x96xf32> to vector<8x96xf32>
    %173 = arith.addf %172, %14 : vector<8x96xf32>
    %cst_45 = arith.constant dense<0.000000e+00> : vector<8x96xf32>
    %174 = tpu.matmul %171, %0, %cst_45 {dimension_numbers = #tpu.dot_dimension_numbers<[1], [0], [0], [1], [0, 0, 1, 1], [], []>} : vector<8x32xf32>, vector<32x96xf32>, vector<8x96xf32> -> vector<8x96xf32>
    %175 = vector.extract_strided_slice %173 {offsets = [0, 0], sizes = [8, 32], strides = [1, 1]} : vector<8x96xf32> to vector<8x32xf32>
    %176 = vector.extract_strided_slice %174 {offsets = [0, 0], sizes = [8, 32], strides = [1, 1]} : vector<8x96xf32> to vector<8x32xf32>
    %177 = arith.addf %175, %176 : vector<8x32xf32>
    %178 = arith.negf %177 : vector<8x32xf32>
    %179 = math.exp %178 : vector<8x32xf32>
    %cst_46 = arith.constant 1.000000e+00 : f32
    %180 = vector.broadcast %cst_46 : f32 to vector<8x32xf32>
    %181 = arith.addf %180, %179 : vector<8x32xf32>
    %182 = arith.divf %180, %181 : vector<8x32xf32>
    %183 = vector.extract_strided_slice %173 {offsets = [0, 32], sizes = [8, 32], strides = [1, 1]} : vector<8x96xf32> to vector<8x32xf32>
    %184 = vector.extract_strided_slice %174 {offsets = [0, 32], sizes = [8, 32], strides = [1, 1]} : vector<8x96xf32> to vector<8x32xf32>
    %185 = arith.addf %183, %184 : vector<8x32xf32>
    %186 = arith.negf %185 : vector<8x32xf32>
    %187 = math.exp %186 : vector<8x32xf32>
    %cst_47 = arith.constant 1.000000e+00 : f32
    %188 = vector.broadcast %cst_47 : f32 to vector<8x32xf32>
    %189 = arith.addf %188, %187 : vector<8x32xf32>
    %190 = arith.divf %188, %189 : vector<8x32xf32>
    %191 = vector.extract_strided_slice %173 {offsets = [0, 64], sizes = [8, 32], strides = [1, 1]} : vector<8x96xf32> to vector<8x32xf32>
    %192 = vector.extract_strided_slice %174 {offsets = [0, 64], sizes = [8, 32], strides = [1, 1]} : vector<8x96xf32> to vector<8x32xf32>
    %193 = vector.broadcast %4 : vector<1x32xf32> to vector<8x32xf32>
    %194 = arith.addf %192, %193 : vector<8x32xf32>
    %195 = arith.mulf %182, %194 : vector<8x32xf32>
    %196 = arith.addf %191, %195 : vector<8x32xf32>
    %197 = math.tanh %196 : vector<8x32xf32>
    %cst_48 = arith.constant 1.000000e+00 : f32
    %198 = vector.broadcast %cst_48 : f32 to vector<8x32xf32>
    %199 = arith.subf %198, %190 : vector<8x32xf32>
    %200 = arith.mulf %199, %197 : vector<8x32xf32>
    %201 = arith.mulf %190, %171 : vector<8x32xf32>
    %202 = arith.addf %200, %201 : vector<8x32xf32>
    %203 = vector.extract_strided_slice %8 {offsets = [48, 0], sizes = [8, 96], strides = [1, 1]} : vector<64x96xf32> to vector<8x96xf32>
    %204 = arith.addf %203, %14 : vector<8x96xf32>
    %cst_49 = arith.constant dense<0.000000e+00> : vector<8x96xf32>
    %205 = tpu.matmul %202, %0, %cst_49 {dimension_numbers = #tpu.dot_dimension_numbers<[1], [0], [0], [1], [0, 0, 1, 1], [], []>} : vector<8x32xf32>, vector<32x96xf32>, vector<8x96xf32> -> vector<8x96xf32>
    %206 = vector.extract_strided_slice %204 {offsets = [0, 0], sizes = [8, 32], strides = [1, 1]} : vector<8x96xf32> to vector<8x32xf32>
    %207 = vector.extract_strided_slice %205 {offsets = [0, 0], sizes = [8, 32], strides = [1, 1]} : vector<8x96xf32> to vector<8x32xf32>
    %208 = arith.addf %206, %207 : vector<8x32xf32>
    %209 = arith.negf %208 : vector<8x32xf32>
    %210 = math.exp %209 : vector<8x32xf32>
    %cst_50 = arith.constant 1.000000e+00 : f32
    %211 = vector.broadcast %cst_50 : f32 to vector<8x32xf32>
    %212 = arith.addf %211, %210 : vector<8x32xf32>
    %213 = arith.divf %211, %212 : vector<8x32xf32>
    %214 = vector.extract_strided_slice %204 {offsets = [0, 32], sizes = [8, 32], strides = [1, 1]} : vector<8x96xf32> to vector<8x32xf32>
    %215 = vector.extract_strided_slice %205 {offsets = [0, 32], sizes = [8, 32], strides = [1, 1]} : vector<8x96xf32> to vector<8x32xf32>
    %216 = arith.addf %214, %215 : vector<8x32xf32>
    %217 = arith.negf %216 : vector<8x32xf32>
    %218 = math.exp %217 : vector<8x32xf32>
    %cst_51 = arith.constant 1.000000e+00 : f32
    %219 = vector.broadcast %cst_51 : f32 to vector<8x32xf32>
    %220 = arith.addf %219, %218 : vector<8x32xf32>
    %221 = arith.divf %219, %220 : vector<8x32xf32>
    %222 = vector.extract_strided_slice %204 {offsets = [0, 64], sizes = [8, 32], strides = [1, 1]} : vector<8x96xf32> to vector<8x32xf32>
    %223 = vector.extract_strided_slice %205 {offsets = [0, 64], sizes = [8, 32], strides = [1, 1]} : vector<8x96xf32> to vector<8x32xf32>
    %224 = vector.broadcast %4 : vector<1x32xf32> to vector<8x32xf32>
    %225 = arith.addf %223, %224 : vector<8x32xf32>
    %226 = arith.mulf %213, %225 : vector<8x32xf32>
    %227 = arith.addf %222, %226 : vector<8x32xf32>
    %228 = math.tanh %227 : vector<8x32xf32>
    %cst_52 = arith.constant 1.000000e+00 : f32
    %229 = vector.broadcast %cst_52 : f32 to vector<8x32xf32>
    %230 = arith.subf %229, %221 : vector<8x32xf32>
    %231 = arith.mulf %230, %228 : vector<8x32xf32>
    %232 = arith.mulf %221, %202 : vector<8x32xf32>
    %233 = arith.addf %231, %232 : vector<8x32xf32>
    %234 = vector.extract_strided_slice %8 {offsets = [56, 0], sizes = [8, 96], strides = [1, 1]} : vector<64x96xf32> to vector<8x96xf32>
    %235 = arith.addf %234, %14 : vector<8x96xf32>
    %cst_53 = arith.constant dense<0.000000e+00> : vector<8x96xf32>
    %236 = tpu.matmul %233, %0, %cst_53 {dimension_numbers = #tpu.dot_dimension_numbers<[1], [0], [0], [1], [0, 0, 1, 1], [], []>} : vector<8x32xf32>, vector<32x96xf32>, vector<8x96xf32> -> vector<8x96xf32>
    %237 = vector.extract_strided_slice %235 {offsets = [0, 0], sizes = [8, 32], strides = [1, 1]} : vector<8x96xf32> to vector<8x32xf32>
    %238 = vector.extract_strided_slice %236 {offsets = [0, 0], sizes = [8, 32], strides = [1, 1]} : vector<8x96xf32> to vector<8x32xf32>
    %239 = arith.addf %237, %238 : vector<8x32xf32>
    %240 = arith.negf %239 : vector<8x32xf32>
    %241 = math.exp %240 : vector<8x32xf32>
    %cst_54 = arith.constant 1.000000e+00 : f32
    %242 = vector.broadcast %cst_54 : f32 to vector<8x32xf32>
    %243 = arith.addf %242, %241 : vector<8x32xf32>
    %244 = arith.divf %242, %243 : vector<8x32xf32>
    %245 = vector.extract_strided_slice %235 {offsets = [0, 32], sizes = [8, 32], strides = [1, 1]} : vector<8x96xf32> to vector<8x32xf32>
    %246 = vector.extract_strided_slice %236 {offsets = [0, 32], sizes = [8, 32], strides = [1, 1]} : vector<8x96xf32> to vector<8x32xf32>
    %247 = arith.addf %245, %246 : vector<8x32xf32>
    %248 = arith.negf %247 : vector<8x32xf32>
    %249 = math.exp %248 : vector<8x32xf32>
    %cst_55 = arith.constant 1.000000e+00 : f32
    %250 = vector.broadcast %cst_55 : f32 to vector<8x32xf32>
    %251 = arith.addf %250, %249 : vector<8x32xf32>
    %252 = arith.divf %250, %251 : vector<8x32xf32>
    %253 = vector.extract_strided_slice %235 {offsets = [0, 64], sizes = [8, 32], strides = [1, 1]} : vector<8x96xf32> to vector<8x32xf32>
    %254 = vector.extract_strided_slice %236 {offsets = [0, 64], sizes = [8, 32], strides = [1, 1]} : vector<8x96xf32> to vector<8x32xf32>
    %255 = vector.broadcast %4 : vector<1x32xf32> to vector<8x32xf32>
    %256 = arith.addf %254, %255 : vector<8x32xf32>
    %257 = arith.mulf %244, %256 : vector<8x32xf32>
    %258 = arith.addf %253, %257 : vector<8x32xf32>
    %259 = math.tanh %258 : vector<8x32xf32>
    %cst_56 = arith.constant 1.000000e+00 : f32
    %260 = vector.broadcast %cst_56 : f32 to vector<8x32xf32>
    %261 = arith.subf %260, %252 : vector<8x32xf32>
    %262 = arith.mulf %261, %259 : vector<8x32xf32>
    %263 = arith.mulf %252, %233 : vector<8x32xf32>
    %264 = arith.addf %262, %263 : vector<8x32xf32>
    %c0_57 = arith.constant 0 : index
    %c0_58 = arith.constant 0 : index
    %c0_59 = arith.constant 0 : index
    %265 = vector.load %arg15[%c0_57, %c0_58, %c0_59] : memref<2x8x32xf32, #tpu.memory_space<vmem>>, vector<1x8x32xf32>
    %266 = vector.shape_cast %265 : vector<1x8x32xf32> to vector<8x32xf32>
    %267 = vector.shape_cast %264 : vector<8x32xf32> to vector<1x8x32xf32>
    tpu.vector_store %arg15[%c0_57, %c0_58, %c0_59], %267 {strides = array<i32>} : memref<2x8x32xf32, #tpu.memory_space<vmem>>, vector<1x8x32xf32>,
    %c1 = arith.constant 1 : index
    %c0_60 = arith.constant 0 : index
    %c0_61 = arith.constant 0 : index
    %268 = vector.load %arg2[%c1, %c0_60, %c0_61] : memref<2x8x32xf32, #tpu.memory_space<vmem>>, vector<1x8x32xf32>
    %269 = vector.shape_cast %268 : vector<1x8x32xf32> to vector<8x32xf32>
    %cst_62 = arith.constant dense<0.000000e+00> : vector<8x96xf32>
    %270 = tpu.matmul %47, %2, %cst_62 {dimension_numbers = #tpu.dot_dimension_numbers<[1], [0], [0], [1], [0, 0, 1, 1], [], []>} : vector<8x32xf32>, vector<32x96xf32>, vector<8x96xf32> -> vector<8x96xf32>
    %271 = vector.broadcast %3 : vector<1x96xf32> to vector<8x96xf32>
    %272 = arith.addf %270, %271 : vector<8x96xf32>
    %cst_63 = arith.constant dense<0.000000e+00> : vector<8x96xf32>
    %273 = tpu.matmul %269, %1, %cst_63 {dimension_numbers = #tpu.dot_dimension_numbers<[1], [0], [0], [1], [0, 0, 1, 1], [], []>} : vector<8x32xf32>, vector<32x96xf32>, vector<8x96xf32> -> vector<8x96xf32>
    %274 = vector.extract_strided_slice %272 {offsets = [0, 0], sizes = [8, 32], strides = [1, 1]} : vector<8x96xf32> to vector<8x32xf32>
    %275 = vector.extract_strided_slice %273 {offsets = [0, 0], sizes = [8, 32], strides = [1, 1]} : vector<8x96xf32> to vector<8x32xf32>
    %276 = arith.addf %274, %275 : vector<8x32xf32>
    %277 = arith.negf %276 : vector<8x32xf32>
    %278 = math.exp %277 : vector<8x32xf32>
    %cst_64 = arith.constant 1.000000e+00 : f32
    %279 = vector.broadcast %cst_64 : f32 to vector<8x32xf32>
    %280 = arith.addf %279, %278 : vector<8x32xf32>
    %281 = arith.divf %279, %280 : vector<8x32xf32>
    %282 = vector.extract_strided_slice %272 {offsets = [0, 32], sizes = [8, 32], strides = [1, 1]} : vector<8x96xf32> to vector<8x32xf32>
    %283 = vector.extract_strided_slice %273 {offsets = [0, 32], sizes = [8, 32], strides = [1, 1]} : vector<8x96xf32> to vector<8x32xf32>
    %284 = arith.addf %282, %283 : vector<8x32xf32>
    %285 = arith.negf %284 : vector<8x32xf32>
    %286 = math.exp %285 : vector<8x32xf32>
    %cst_65 = arith.constant 1.000000e+00 : f32
    %287 = vector.broadcast %cst_65 : f32 to vector<8x32xf32>
    %288 = arith.addf %287, %286 : vector<8x32xf32>
    %289 = arith.divf %287, %288 : vector<8x32xf32>
    %290 = vector.extract_strided_slice %272 {offsets = [0, 64], sizes = [8, 32], strides = [1, 1]} : vector<8x96xf32> to vector<8x32xf32>
    %291 = vector.extract_strided_slice %273 {offsets = [0, 64], sizes = [8, 32], strides = [1, 1]} : vector<8x96xf32> to vector<8x32xf32>
    %292 = vector.broadcast %5 : vector<1x32xf32> to vector<8x32xf32>
    %293 = arith.addf %291, %292 : vector<8x32xf32>
    %294 = arith.mulf %281, %293 : vector<8x32xf32>
    %295 = arith.addf %290, %294 : vector<8x32xf32>
    %296 = math.tanh %295 : vector<8x32xf32>
    %cst_66 = arith.constant 1.000000e+00 : f32
    %297 = vector.broadcast %cst_66 : f32 to vector<8x32xf32>
    %298 = arith.subf %297, %289 : vector<8x32xf32>
    %299 = arith.mulf %298, %296 : vector<8x32xf32>
    %300 = arith.mulf %289, %269 : vector<8x32xf32>
    %301 = arith.addf %299, %300 : vector<8x32xf32>
    %cst_67 = arith.constant dense<0.000000e+00> : vector<8x96xf32>
    %302 = tpu.matmul %78, %2, %cst_67 {dimension_numbers = #tpu.dot_dimension_numbers<[1], [0], [0], [1], [0, 0, 1, 1], [], []>} : vector<8x32xf32>, vector<32x96xf32>, vector<8x96xf32> -> vector<8x96xf32>
    %303 = vector.broadcast %3 : vector<1x96xf32> to vector<8x96xf32>
    %304 = arith.addf %302, %303 : vector<8x96xf32>
    %cst_68 = arith.constant dense<0.000000e+00> : vector<8x96xf32>
    %305 = tpu.matmul %301, %1, %cst_68 {dimension_numbers = #tpu.dot_dimension_numbers<[1], [0], [0], [1], [0, 0, 1, 1], [], []>} : vector<8x32xf32>, vector<32x96xf32>, vector<8x96xf32> -> vector<8x96xf32>
    %306 = vector.extract_strided_slice %304 {offsets = [0, 0], sizes = [8, 32], strides = [1, 1]} : vector<8x96xf32> to vector<8x32xf32>
    %307 = vector.extract_strided_slice %305 {offsets = [0, 0], sizes = [8, 32], strides = [1, 1]} : vector<8x96xf32> to vector<8x32xf32>
    %308 = arith.addf %306, %307 : vector<8x32xf32>
    %309 = arith.negf %308 : vector<8x32xf32>
    %310 = math.exp %309 : vector<8x32xf32>
    %cst_69 = arith.constant 1.000000e+00 : f32
    %311 = vector.broadcast %cst_69 : f32 to vector<8x32xf32>
    %312 = arith.addf %311, %310 : vector<8x32xf32>
    %313 = arith.divf %311, %312 : vector<8x32xf32>
    %314 = vector.extract_strided_slice %304 {offsets = [0, 32], sizes = [8, 32], strides = [1, 1]} : vector<8x96xf32> to vector<8x32xf32>
    %315 = vector.extract_strided_slice %305 {offsets = [0, 32], sizes = [8, 32], strides = [1, 1]} : vector<8x96xf32> to vector<8x32xf32>
    %316 = arith.addf %314, %315 : vector<8x32xf32>
    %317 = arith.negf %316 : vector<8x32xf32>
    %318 = math.exp %317 : vector<8x32xf32>
    %cst_70 = arith.constant 1.000000e+00 : f32
    %319 = vector.broadcast %cst_70 : f32 to vector<8x32xf32>
    %320 = arith.addf %319, %318 : vector<8x32xf32>
    %321 = arith.divf %319, %320 : vector<8x32xf32>
    %322 = vector.extract_strided_slice %304 {offsets = [0, 64], sizes = [8, 32], strides = [1, 1]} : vector<8x96xf32> to vector<8x32xf32>
    %323 = vector.extract_strided_slice %305 {offsets = [0, 64], sizes = [8, 32], strides = [1, 1]} : vector<8x96xf32> to vector<8x32xf32>
    %324 = vector.broadcast %5 : vector<1x32xf32> to vector<8x32xf32>
    %325 = arith.addf %323, %324 : vector<8x32xf32>
    %326 = arith.mulf %313, %325 : vector<8x32xf32>
    %327 = arith.addf %322, %326 : vector<8x32xf32>
    %328 = math.tanh %327 : vector<8x32xf32>
    %cst_71 = arith.constant 1.000000e+00 : f32
    %329 = vector.broadcast %cst_71 : f32 to vector<8x32xf32>
    %330 = arith.subf %329, %321 : vector<8x32xf32>
    %331 = arith.mulf %330, %328 : vector<8x32xf32>
    %332 = arith.mulf %321, %301 : vector<8x32xf32>
    %333 = arith.addf %331, %332 : vector<8x32xf32>
    %cst_72 = arith.constant dense<0.000000e+00> : vector<8x96xf32>
    %334 = tpu.matmul %109, %2, %cst_72 {dimension_numbers = #tpu.dot_dimension_numbers<[1], [0], [0], [1], [0, 0, 1, 1], [], []>} : vector<8x32xf32>, vector<32x96xf32>, vector<8x96xf32> -> vector<8x96xf32>
    %335 = vector.broadcast %3 : vector<1x96xf32> to vector<8x96xf32>
    %336 = arith.addf %334, %335 : vector<8x96xf32>
    %cst_73 = arith.constant dense<0.000000e+00> : vector<8x96xf32>
    %337 = tpu.matmul %333, %1, %cst_73 {dimension_numbers = #tpu.dot_dimension_numbers<[1], [0], [0], [1], [0, 0, 1, 1], [], []>} : vector<8x32xf32>, vector<32x96xf32>, vector<8x96xf32> -> vector<8x96xf32>
    %338 = vector.extract_strided_slice %336 {offsets = [0, 0], sizes = [8, 32], strides = [1, 1]} : vector<8x96xf32> to vector<8x32xf32>
    %339 = vector.extract_strided_slice %337 {offsets = [0, 0], sizes = [8, 32], strides = [1, 1]} : vector<8x96xf32> to vector<8x32xf32>
    %340 = arith.addf %338, %339 : vector<8x32xf32>
    %341 = arith.negf %340 : vector<8x32xf32>
    %342 = math.exp %341 : vector<8x32xf32>
    %cst_74 = arith.constant 1.000000e+00 : f32
    %343 = vector.broadcast %cst_74 : f32 to vector<8x32xf32>
    %344 = arith.addf %343, %342 : vector<8x32xf32>
    %345 = arith.divf %343, %344 : vector<8x32xf32>
    %346 = vector.extract_strided_slice %336 {offsets = [0, 32], sizes = [8, 32], strides = [1, 1]} : vector<8x96xf32> to vector<8x32xf32>
    %347 = vector.extract_strided_slice %337 {offsets = [0, 32], sizes = [8, 32], strides = [1, 1]} : vector<8x96xf32> to vector<8x32xf32>
    %348 = arith.addf %346, %347 : vector<8x32xf32>
    %349 = arith.negf %348 : vector<8x32xf32>
    %350 = math.exp %349 : vector<8x32xf32>
    %cst_75 = arith.constant 1.000000e+00 : f32
    %351 = vector.broadcast %cst_75 : f32 to vector<8x32xf32>
    %352 = arith.addf %351, %350 : vector<8x32xf32>
    %353 = arith.divf %351, %352 : vector<8x32xf32>
    %354 = vector.extract_strided_slice %336 {offsets = [0, 64], sizes = [8, 32], strides = [1, 1]} : vector<8x96xf32> to vector<8x32xf32>
    %355 = vector.extract_strided_slice %337 {offsets = [0, 64], sizes = [8, 32], strides = [1, 1]} : vector<8x96xf32> to vector<8x32xf32>
    %356 = vector.broadcast %5 : vector<1x32xf32> to vector<8x32xf32>
    %357 = arith.addf %355, %356 : vector<8x32xf32>
    %358 = arith.mulf %345, %357 : vector<8x32xf32>
    %359 = arith.addf %354, %358 : vector<8x32xf32>
    %360 = math.tanh %359 : vector<8x32xf32>
    %cst_76 = arith.constant 1.000000e+00 : f32
    %361 = vector.broadcast %cst_76 : f32 to vector<8x32xf32>
    %362 = arith.subf %361, %353 : vector<8x32xf32>
    %363 = arith.mulf %362, %360 : vector<8x32xf32>
    %364 = arith.mulf %353, %333 : vector<8x32xf32>
    %365 = arith.addf %363, %364 : vector<8x32xf32>
    %cst_77 = arith.constant dense<0.000000e+00> : vector<8x96xf32>
    %366 = tpu.matmul %140, %2, %cst_77 {dimension_numbers = #tpu.dot_dimension_numbers<[1], [0], [0], [1], [0, 0, 1, 1], [], []>} : vector<8x32xf32>, vector<32x96xf32>, vector<8x96xf32> -> vector<8x96xf32>
    %367 = vector.broadcast %3 : vector<1x96xf32> to vector<8x96xf32>
    %368 = arith.addf %366, %367 : vector<8x96xf32>
    %cst_78 = arith.constant dense<0.000000e+00> : vector<8x96xf32>
    %369 = tpu.matmul %365, %1, %cst_78 {dimension_numbers = #tpu.dot_dimension_numbers<[1], [0], [0], [1], [0, 0, 1, 1], [], []>} : vector<8x32xf32>, vector<32x96xf32>, vector<8x96xf32> -> vector<8x96xf32>
    %370 = vector.extract_strided_slice %368 {offsets = [0, 0], sizes = [8, 32], strides = [1, 1]} : vector<8x96xf32> to vector<8x32xf32>
    %371 = vector.extract_strided_slice %369 {offsets = [0, 0], sizes = [8, 32], strides = [1, 1]} : vector<8x96xf32> to vector<8x32xf32>
    %372 = arith.addf %370, %371 : vector<8x32xf32>
    %373 = arith.negf %372 : vector<8x32xf32>
    %374 = math.exp %373 : vector<8x32xf32>
    %cst_79 = arith.constant 1.000000e+00 : f32
    %375 = vector.broadcast %cst_79 : f32 to vector<8x32xf32>
    %376 = arith.addf %375, %374 : vector<8x32xf32>
    %377 = arith.divf %375, %376 : vector<8x32xf32>
    %378 = vector.extract_strided_slice %368 {offsets = [0, 32], sizes = [8, 32], strides = [1, 1]} : vector<8x96xf32> to vector<8x32xf32>
    %379 = vector.extract_strided_slice %369 {offsets = [0, 32], sizes = [8, 32], strides = [1, 1]} : vector<8x96xf32> to vector<8x32xf32>
    %380 = arith.addf %378, %379 : vector<8x32xf32>
    %381 = arith.negf %380 : vector<8x32xf32>
    %382 = math.exp %381 : vector<8x32xf32>
    %cst_80 = arith.constant 1.000000e+00 : f32
    %383 = vector.broadcast %cst_80 : f32 to vector<8x32xf32>
    %384 = arith.addf %383, %382 : vector<8x32xf32>
    %385 = arith.divf %383, %384 : vector<8x32xf32>
    %386 = vector.extract_strided_slice %368 {offsets = [0, 64], sizes = [8, 32], strides = [1, 1]} : vector<8x96xf32> to vector<8x32xf32>
    %387 = vector.extract_strided_slice %369 {offsets = [0, 64], sizes = [8, 32], strides = [1, 1]} : vector<8x96xf32> to vector<8x32xf32>
    %388 = vector.broadcast %5 : vector<1x32xf32> to vector<8x32xf32>
    %389 = arith.addf %387, %388 : vector<8x32xf32>
    %390 = arith.mulf %377, %389 : vector<8x32xf32>
    %391 = arith.addf %386, %390 : vector<8x32xf32>
    %392 = math.tanh %391 : vector<8x32xf32>
    %cst_81 = arith.constant 1.000000e+00 : f32
    %393 = vector.broadcast %cst_81 : f32 to vector<8x32xf32>
    %394 = arith.subf %393, %385 : vector<8x32xf32>
    %395 = arith.mulf %394, %392 : vector<8x32xf32>
    %396 = arith.mulf %385, %365 : vector<8x32xf32>
    %397 = arith.addf %395, %396 : vector<8x32xf32>
    %cst_82 = arith.constant dense<0.000000e+00> : vector<8x96xf32>
    %398 = tpu.matmul %171, %2, %cst_82 {dimension_numbers = #tpu.dot_dimension_numbers<[1], [0], [0], [1], [0, 0, 1, 1], [], []>} : vector<8x32xf32>, vector<32x96xf32>, vector<8x96xf32> -> vector<8x96xf32>
    %399 = vector.broadcast %3 : vector<1x96xf32> to vector<8x96xf32>
    %400 = arith.addf %398, %399 : vector<8x96xf32>
    %cst_83 = arith.constant dense<0.000000e+00> : vector<8x96xf32>
    %401 = tpu.matmul %397, %1, %cst_83 {dimension_numbers = #tpu.dot_dimension_numbers<[1], [0], [0], [1], [0, 0, 1, 1], [], []>} : vector<8x32xf32>, vector<32x96xf32>, vector<8x96xf32> -> vector<8x96xf32>
    %402 = vector.extract_strided_slice %400 {offsets = [0, 0], sizes = [8, 32], strides = [1, 1]} : vector<8x96xf32> to vector<8x32xf32>
    %403 = vector.extract_strided_slice %401 {offsets = [0, 0], sizes = [8, 32], strides = [1, 1]} : vector<8x96xf32> to vector<8x32xf32>
    %404 = arith.addf %402, %403 : vector<8x32xf32>
    %405 = arith.negf %404 : vector<8x32xf32>
    %406 = math.exp %405 : vector<8x32xf32>
    %cst_84 = arith.constant 1.000000e+00 : f32
    %407 = vector.broadcast %cst_84 : f32 to vector<8x32xf32>
    %408 = arith.addf %407, %406 : vector<8x32xf32>
    %409 = arith.divf %407, %408 : vector<8x32xf32>
    %410 = vector.extract_strided_slice %400 {offsets = [0, 32], sizes = [8, 32], strides = [1, 1]} : vector<8x96xf32> to vector<8x32xf32>
    %411 = vector.extract_strided_slice %401 {offsets = [0, 32], sizes = [8, 32], strides = [1, 1]} : vector<8x96xf32> to vector<8x32xf32>
    %412 = arith.addf %410, %411 : vector<8x32xf32>
    %413 = arith.negf %412 : vector<8x32xf32>
    %414 = math.exp %413 : vector<8x32xf32>
    %cst_85 = arith.constant 1.000000e+00 : f32
    %415 = vector.broadcast %cst_85 : f32 to vector<8x32xf32>
    %416 = arith.addf %415, %414 : vector<8x32xf32>
    %417 = arith.divf %415, %416 : vector<8x32xf32>
    %418 = vector.extract_strided_slice %400 {offsets = [0, 64], sizes = [8, 32], strides = [1, 1]} : vector<8x96xf32> to vector<8x32xf32>
    %419 = vector.extract_strided_slice %401 {offsets = [0, 64], sizes = [8, 32], strides = [1, 1]} : vector<8x96xf32> to vector<8x32xf32>
    %420 = vector.broadcast %5 : vector<1x32xf32> to vector<8x32xf32>
    %421 = arith.addf %419, %420 : vector<8x32xf32>
    %422 = arith.mulf %409, %421 : vector<8x32xf32>
    %423 = arith.addf %418, %422 : vector<8x32xf32>
    %424 = math.tanh %423 : vector<8x32xf32>
    %cst_86 = arith.constant 1.000000e+00 : f32
    %425 = vector.broadcast %cst_86 : f32 to vector<8x32xf32>
    %426 = arith.subf %425, %417 : vector<8x32xf32>
    %427 = arith.mulf %426, %424 : vector<8x32xf32>
    %428 = arith.mulf %417, %397 : vector<8x32xf32>
    %429 = arith.addf %427, %428 : vector<8x32xf32>
    %cst_87 = arith.constant dense<0.000000e+00> : vector<8x96xf32>
    %430 = tpu.matmul %202, %2, %cst_87 {dimension_numbers = #tpu.dot_dimension_numbers<[1], [0], [0], [1], [0, 0, 1, 1], [], []>} : vector<8x32xf32>, vector<32x96xf32>, vector<8x96xf32> -> vector<8x96xf32>
    %431 = vector.broadcast %3 : vector<1x96xf32> to vector<8x96xf32>
    %432 = arith.addf %430, %431 : vector<8x96xf32>
    %cst_88 = arith.constant dense<0.000000e+00> : vector<8x96xf32>
    %433 = tpu.matmul %429, %1, %cst_88 {dimension_numbers = #tpu.dot_dimension_numbers<[1], [0], [0], [1], [0, 0, 1, 1], [], []>} : vector<8x32xf32>, vector<32x96xf32>, vector<8x96xf32> -> vector<8x96xf32>
    %434 = vector.extract_strided_slice %432 {offsets = [0, 0], sizes = [8, 32], strides = [1, 1]} : vector<8x96xf32> to vector<8x32xf32>
    %435 = vector.extract_strided_slice %433 {offsets = [0, 0], sizes = [8, 32], strides = [1, 1]} : vector<8x96xf32> to vector<8x32xf32>
    %436 = arith.addf %434, %435 : vector<8x32xf32>
    %437 = arith.negf %436 : vector<8x32xf32>
    %438 = math.exp %437 : vector<8x32xf32>
    %cst_89 = arith.constant 1.000000e+00 : f32
    %439 = vector.broadcast %cst_89 : f32 to vector<8x32xf32>
    %440 = arith.addf %439, %438 : vector<8x32xf32>
    %441 = arith.divf %439, %440 : vector<8x32xf32>
    %442 = vector.extract_strided_slice %432 {offsets = [0, 32], sizes = [8, 32], strides = [1, 1]} : vector<8x96xf32> to vector<8x32xf32>
    %443 = vector.extract_strided_slice %433 {offsets = [0, 32], sizes = [8, 32], strides = [1, 1]} : vector<8x96xf32> to vector<8x32xf32>
    %444 = arith.addf %442, %443 : vector<8x32xf32>
    %445 = arith.negf %444 : vector<8x32xf32>
    %446 = math.exp %445 : vector<8x32xf32>
    %cst_90 = arith.constant 1.000000e+00 : f32
    %447 = vector.broadcast %cst_90 : f32 to vector<8x32xf32>
    %448 = arith.addf %447, %446 : vector<8x32xf32>
    %449 = arith.divf %447, %448 : vector<8x32xf32>
    %450 = vector.extract_strided_slice %432 {offsets = [0, 64], sizes = [8, 32], strides = [1, 1]} : vector<8x96xf32> to vector<8x32xf32>
    %451 = vector.extract_strided_slice %433 {offsets = [0, 64], sizes = [8, 32], strides = [1, 1]} : vector<8x96xf32> to vector<8x32xf32>
    %452 = vector.broadcast %5 : vector<1x32xf32> to vector<8x32xf32>
    %453 = arith.addf %451, %452 : vector<8x32xf32>
    %454 = arith.mulf %441, %453 : vector<8x32xf32>
    %455 = arith.addf %450, %454 : vector<8x32xf32>
    %456 = math.tanh %455 : vector<8x32xf32>
    %cst_91 = arith.constant 1.000000e+00 : f32
    %457 = vector.broadcast %cst_91 : f32 to vector<8x32xf32>
    %458 = arith.subf %457, %449 : vector<8x32xf32>
    %459 = arith.mulf %458, %456 : vector<8x32xf32>
    %460 = arith.mulf %449, %429 : vector<8x32xf32>
    %461 = arith.addf %459, %460 : vector<8x32xf32>
    %cst_92 = arith.constant dense<0.000000e+00> : vector<8x96xf32>
    %462 = tpu.matmul %233, %2, %cst_92 {dimension_numbers = #tpu.dot_dimension_numbers<[1], [0], [0], [1], [0, 0, 1, 1], [], []>} : vector<8x32xf32>, vector<32x96xf32>, vector<8x96xf32> -> vector<8x96xf32>
    %463 = vector.broadcast %3 : vector<1x96xf32> to vector<8x96xf32>
    %464 = arith.addf %462, %463 : vector<8x96xf32>
    %cst_93 = arith.constant dense<0.000000e+00> : vector<8x96xf32>
    %465 = tpu.matmul %461, %1, %cst_93 {dimension_numbers = #tpu.dot_dimension_numbers<[1], [0], [0], [1], [0, 0, 1, 1], [], []>} : vector<8x32xf32>, vector<32x96xf32>, vector<8x96xf32> -> vector<8x96xf32>
    %466 = vector.extract_strided_slice %464 {offsets = [0, 0], sizes = [8, 32], strides = [1, 1]} : vector<8x96xf32> to vector<8x32xf32>
    %467 = vector.extract_strided_slice %465 {offsets = [0, 0], sizes = [8, 32], strides = [1, 1]} : vector<8x96xf32> to vector<8x32xf32>
    %468 = arith.addf %466, %467 : vector<8x32xf32>
    %469 = arith.negf %468 : vector<8x32xf32>
    %470 = math.exp %469 : vector<8x32xf32>
    %cst_94 = arith.constant 1.000000e+00 : f32
    %471 = vector.broadcast %cst_94 : f32 to vector<8x32xf32>
    %472 = arith.addf %471, %470 : vector<8x32xf32>
    %473 = arith.divf %471, %472 : vector<8x32xf32>
    %474 = vector.extract_strided_slice %464 {offsets = [0, 32], sizes = [8, 32], strides = [1, 1]} : vector<8x96xf32> to vector<8x32xf32>
    %475 = vector.extract_strided_slice %465 {offsets = [0, 32], sizes = [8, 32], strides = [1, 1]} : vector<8x96xf32> to vector<8x32xf32>
    %476 = arith.addf %474, %475 : vector<8x32xf32>
    %477 = arith.negf %476 : vector<8x32xf32>
    %478 = math.exp %477 : vector<8x32xf32>
    %cst_95 = arith.constant 1.000000e+00 : f32
    %479 = vector.broadcast %cst_95 : f32 to vector<8x32xf32>
    %480 = arith.addf %479, %478 : vector<8x32xf32>
    %481 = arith.divf %479, %480 : vector<8x32xf32>
    %482 = vector.extract_strided_slice %464 {offsets = [0, 64], sizes = [8, 32], strides = [1, 1]} : vector<8x96xf32> to vector<8x32xf32>
    %483 = vector.extract_strided_slice %465 {offsets = [0, 64], sizes = [8, 32], strides = [1, 1]} : vector<8x96xf32> to vector<8x32xf32>
    %484 = vector.broadcast %5 : vector<1x32xf32> to vector<8x32xf32>
    %485 = arith.addf %483, %484 : vector<8x32xf32>
    %486 = arith.mulf %473, %485 : vector<8x32xf32>
    %487 = arith.addf %482, %486 : vector<8x32xf32>
    %488 = math.tanh %487 : vector<8x32xf32>
    %cst_96 = arith.constant 1.000000e+00 : f32
    %489 = vector.broadcast %cst_96 : f32 to vector<8x32xf32>
    %490 = arith.subf %489, %481 : vector<8x32xf32>
    %491 = arith.mulf %490, %488 : vector<8x32xf32>
    %492 = arith.mulf %481, %461 : vector<8x32xf32>
    %493 = arith.addf %491, %492 : vector<8x32xf32>
    %cst_97 = arith.constant dense<0.000000e+00> : vector<8x96xf32>
    %494 = tpu.matmul %264, %2, %cst_97 {dimension_numbers = #tpu.dot_dimension_numbers<[1], [0], [0], [1], [0, 0, 1, 1], [], []>} : vector<8x32xf32>, vector<32x96xf32>, vector<8x96xf32> -> vector<8x96xf32>
    %495 = vector.broadcast %3 : vector<1x96xf32> to vector<8x96xf32>
    %496 = arith.addf %494, %495 : vector<8x96xf32>
    %cst_98 = arith.constant dense<0.000000e+00> : vector<8x96xf32>
    %497 = tpu.matmul %493, %1, %cst_98 {dimension_numbers = #tpu.dot_dimension_numbers<[1], [0], [0], [1], [0, 0, 1, 1], [], []>} : vector<8x32xf32>, vector<32x96xf32>, vector<8x96xf32> -> vector<8x96xf32>
    %498 = vector.extract_strided_slice %496 {offsets = [0, 0], sizes = [8, 32], strides = [1, 1]} : vector<8x96xf32> to vector<8x32xf32>
    %499 = vector.extract_strided_slice %497 {offsets = [0, 0], sizes = [8, 32], strides = [1, 1]} : vector<8x96xf32> to vector<8x32xf32>
    %500 = arith.addf %498, %499 : vector<8x32xf32>
    %501 = arith.negf %500 : vector<8x32xf32>
    %502 = math.exp %501 : vector<8x32xf32>
    %cst_99 = arith.constant 1.000000e+00 : f32
    %503 = vector.broadcast %cst_99 : f32 to vector<8x32xf32>
    %504 = arith.addf %503, %502 : vector<8x32xf32>
    %505 = arith.divf %503, %504 : vector<8x32xf32>
    %506 = vector.extract_strided_slice %496 {offsets = [0, 32], sizes = [8, 32], strides = [1, 1]} : vector<8x96xf32> to vector<8x32xf32>
    %507 = vector.extract_strided_slice %497 {offsets = [0, 32], sizes = [8, 32], strides = [1, 1]} : vector<8x96xf32> to vector<8x32xf32>
    %508 = arith.addf %506, %507 : vector<8x32xf32>
    %509 = arith.negf %508 : vector<8x32xf32>
    %510 = math.exp %509 : vector<8x32xf32>
    %cst_100 = arith.constant 1.000000e+00 : f32
    %511 = vector.broadcast %cst_100 : f32 to vector<8x32xf32>
    %512 = arith.addf %511, %510 : vector<8x32xf32>
    %513 = arith.divf %511, %512 : vector<8x32xf32>
    %514 = vector.extract_strided_slice %496 {offsets = [0, 64], sizes = [8, 32], strides = [1, 1]} : vector<8x96xf32> to vector<8x32xf32>
    %515 = vector.extract_strided_slice %497 {offsets = [0, 64], sizes = [8, 32], strides = [1, 1]} : vector<8x96xf32> to vector<8x32xf32>
    %516 = vector.broadcast %5 : vector<1x32xf32> to vector<8x32xf32>
    %517 = arith.addf %515, %516 : vector<8x32xf32>
    %518 = arith.mulf %505, %517 : vector<8x32xf32>
    %519 = arith.addf %514, %518 : vector<8x32xf32>
    %520 = math.tanh %519 : vector<8x32xf32>
    %cst_101 = arith.constant 1.000000e+00 : f32
    %521 = vector.broadcast %cst_101 : f32 to vector<8x32xf32>
    %522 = arith.subf %521, %513 : vector<8x32xf32>
    %523 = arith.mulf %522, %520 : vector<8x32xf32>
    %524 = arith.mulf %513, %493 : vector<8x32xf32>
    %525 = arith.addf %523, %524 : vector<8x32xf32>
    %c1_102 = arith.constant 1 : index
    %c0_103 = arith.constant 0 : index
    %c0_104 = arith.constant 0 : index
    %526 = vector.load %arg15[%c1_102, %c0_103, %c0_104] : memref<2x8x32xf32, #tpu.memory_space<vmem>>, vector<1x8x32xf32>
    %527 = vector.shape_cast %526 : vector<1x8x32xf32> to vector<8x32xf32>
    %528 = vector.shape_cast %525 : vector<8x32xf32> to vector<1x8x32xf32>
    tpu.vector_store %arg15[%c1_102, %c0_103, %c0_104], %528 {strides = array<i32>} : memref<2x8x32xf32, #tpu.memory_space<vmem>>, vector<1x8x32xf32>,
    %529 = tpu.concatenate %301, %333, %365, %397, %429, %461, %493, %525 in 0 : vector<8x32xf32>, vector<8x32xf32>, vector<8x32xf32>, vector<8x32xf32>, vector<8x32xf32>, vector<8x32xf32>, vector<8x32xf32>, vector<8x32xf32> -> vector<64x32xf32>
    %c0_105 = arith.constant 0 : index
    %c0_106 = arith.constant 0 : index
    %530 = vector.load %arg12[%c0_105, %c0_106] : memref<32x40xf32, #tpu.memory_space<vmem>>, vector<32x40xf32>
    %cst_107 = arith.constant dense<0.000000e+00> : vector<64x40xf32>
    %531 = tpu.matmul %529, %530, %cst_107 {dimension_numbers = #tpu.dot_dimension_numbers<[1], [0], [0], [1], [0, 0, 1, 1], [], []>} : vector<64x32xf32>, vector<32x40xf32>, vector<64x40xf32> -> vector<64x40xf32>
    %c0_108 = arith.constant 0 : index
    %c0_109 = arith.constant 0 : index
    %532 = vector.load %arg13[%c0_108, %c0_109] : memref<1x40xf32, #tpu.memory_space<vmem>>, vector<1x40xf32>
    %533 = vector.broadcast %532 : vector<1x40xf32> to vector<64x40xf32>
    %534 = arith.addf %531, %533 : vector<64x40xf32>
    %c0_110 = arith.constant 0 : index
    %c0_111 = arith.constant 0 : index
    %535 = vector.load %arg14[%c0_110, %c0_111] : memref<64x40xf32, #tpu.memory_space<vmem>>, vector<64x40xf32>
    tpu.vector_store %arg14[%c0_110, %c0_111], %534 {strides = array<i32>} : memref<64x40xf32, #tpu.memory_space<vmem>>, vector<64x40xf32>,
    return
  }
}

</mosaic_0001>

<bundles_post_ra>
// kernel: seq2seq_decoder_forward.1
= control target key start
LH: loop header
LB: loop body
LE: loop exit
PB: predicated region body
PF: predicated region fallthrough
CT: control target
= control target key end

     0   :  { %vm75_vm0 = vcmask 130048   ;;  %s2319_s0 = inlined_call_operand.vmem [shape: f32[64,16], index: 0, kind: input, shape index: {}]   ;;  %s2320_s1 = inlined_call_operand.vmem [shape: f32[8,32], index: 1, kind: input, shape index: {}]   ;;  %s2321_s2 = inlined_call_operand.vmem [shape: f32[2,8,32], index: 2, kind: input, shape index: {}]   ;;  %s2322_s3 = inlined_call_operand.vmem [shape: f32[16,96], index: 3, kind: input, shape index: {}]   ;;  %s2323_s4 = inlined_call_operand.vmem [shape: f32[32,96], index: 4, kind: input, shape index: {}]   ;;  %s2324_s5 = inlined_call_operand.vmem [shape: f32[32,96], index: 5, kind: input, shape index: {}]   ;;  %s2325_s6 = inlined_call_operand.vmem [shape: f32[1,96], index: 6, kind: input, shape index: {}]   ;;  %s2326_s7 = inlined_call_operand.vmem [shape: f32[1,32], index: 7, kind: input, shape index: {}]   ;;  %s2327_s8 = inlined_call_operand.vmem [shape: f32[32,96], index: 8, kind: input, shape index: {}]   ;;  %s2328_s9 = inlined_call_operand.vmem [shape: f32[32,96], index: 9, kind: input, shape index: {}]   ;;  %s2329_s10 = inlined_call_operand.vmem [shape: f32[1,96], index: 10, kind: input, shape index: {}]   ;;  %s2330_s11 = inlined_call_operand.vmem [shape: f32[1,32], index: 11, kind: input, shape index: {}]   ;;  %s2331_s12 = inlined_call_operand.vmem [shape: f32[32,40], index: 12, kind: input, shape index: {}]   ;;  %s2332_s13 = inlined_call_operand.vmem [shape: f32[1,40], index: 13, kind: input, shape index: {}]   ;;  %s2333_s14 = inlined_call_operand.vmem [shape: f32[64,40], index: 14, kind: output, shape index: {0}]   ;;  %s2334_s15 = inlined_call_operand.hbm [shape: f32[2,8,32], index: 15, kind: output, shape index: {1}]  }
   0x1   :  { %v74_v0 = vld [vmem:[%s2322_s3 + $0x8] sm:$0xff]  ;;  %v73_v1 = vld [vmem:[%s2322_s3] sm:$0xff]  ;;  %v145_v3 = vld [vmem:[%s2323_s4 + $0x18] sm:$0xff] }
   0x2   :  { %114 = vmatpush.msra.mxu0 %v74_v0  ;;  %v65_v2 = vld [vmem:[%s2319_s0] sm:$0xff]  ;;  %v144_v4 = vld [vmem:[%s2323_s4 + $0x10] sm:$0xff] }
   0x4   :  { %115 = vmatpush.msra.mxu0 %v73_v1 }
   0x5   :  { %1495 = vmatmul.msk.f32.vlgmr.msra.gmra.mxu0 %vm75_vm0, %v65_v2 }
   0x6   :  { %166 = vmatpush.msrb.mxu0 %v145_v3 }
   0x7   :  { %21 = vsyncpa [#allocation3], 0  ;;  %v143_v5 = vld [vmem:[%s2323_s4 + $0x8] sm:$0xff]  ;;  %v67_v7 = vld [vmem:[%s2319_s0 + $0x10] sm:$0xff]  ;;  %s1694_s30 = smov 32   ;;  %s1695_s21 = smov 64  }
   0x8   :  { %167 = vmatpush.msrb.mxu0 %v144_v4  ;;  %v66_v6 = vld [vmem:[%s2319_s0 + $0x8] sm:$0xff]  ;;  %v142_v8 = vld [vmem:[%s2323_s4] sm:$0xff]  ;;  %v68_v9 = vld [vmem:[%s2319_s0 + $0x18] sm:$0xff]  ;;  %vm150_vm1 = vcmask 261120   ;;  %s1699_s4 = smov 8  }
   0x9   :  { %v69_v10 = vld [vmem:[%s2319_s0 + $0x20] sm:$0xff]  ;;  %v1821_v11 = vld [vmem:[%s2324_s5 + $0x18] sm:$0xff]  ;;  %v1826_v12 = vld [vmem:[%s2324_s5 + $0x10] sm:$0xff] }
   0xa   :  { %168 = vmatpush.msrb.mxu0 %v143_v5  ;;  %v174_v13 = vld [vmem:[%s2321_s2] sm:$0xff]  ;;  %265 = vmatpush.msra.mxu3 %v1821_v11  ;;  %v1836_v14 = vld [vmem:[%s2324_s5 + $0x8] sm:$0xff]  ;;  %v71_v18 = vld [vmem:[%s2319_s0 + $0x30] sm:$0xff] }
   0xb   :  { %242 = vrot.lane.b32.xlu2 %v174_v13, %s1694_s30  ;;  %331 = vmatpush.msra.mxu1 %v1821_v11  ;;  %v1845_v15 = vld [vmem:[%s2324_s5] sm:$0xff]  ;;  %v70_v16 = vld [vmem:[%s2319_s0 + $0x28] sm:$0xff]  ;;  %v72_v19 = vld [vmem:[%s2319_s0 + $0x38] sm:$0xff]  ;;  %s1697_s0 = smov [#allocation2]  }
   0xc   :  { %169 = vmatpush.msrb.mxu0 %v142_v8  ;;  %266 = vmatpush.msra.mxu3 %v1826_v12  ;;  %v1567_v17 = vld [vmem:[%s2326_s7] ss:$0 sm:$0xff] }
   0xd   :  { %1496 = vmatmul.msk.f32.gmra.mxu0 %vm75_vm0, %v66_v6  ;;  %332 = vmatpush.msra.mxu1 %v1826_v12  ;;  %v141_v20 = vld [vmem:[%s2320_s1] sm:$0xff]  ;;  %s1696_s1 = smov 96  }
   0xe   :  { %191 = vmatpush.msra.mxu0 %v1821_v11  ;;  %397 = vmatpush.msra.mxu2 %v1821_v11  ;;  %v1568_v29 = vld [vmem:[%s2325_s6] ss:$0 sm:$0xff] }
   0xf   :  { %267 = vmatpush.msra.mxu3 %v1836_v14  ;;  %333 = vmatpush.msra.mxu1 %v1836_v14 }
  0x10   :  { %192 = vmatpush.msra.mxu0 %v1826_v12  ;;  %398 = vmatpush.msra.mxu2 %v1826_v12 }
  0x11   :  { %268 = vmatpush.msra.mxu3 %v1845_v15  ;;  %334 = vmatpush.msra.mxu1 %v1845_v15 }
  0x12   :  { %193 = vmatpush.msra.mxu0 %v1836_v14  ;;  %399 = vmatpush.msra.mxu2 %v1836_v14 }
  0x13   :  { %463 = vmatpush.msrb.mxu3 %v1821_v11  ;;  %221 = vrot.lane.b32.xlu0 %v1567_v17, %s1695_s21 }
  0x14   :  { %194 = vmatpush.msra.mxu0 %v1845_v15  ;;  %529 = vmatpush.msrb.mxu1 %v1821_v11 }
  0x15   :  { %1497 = vmatmul.msk.f32.gmra.mxu0 %vm75_vm0, %v67_v7  ;;  %400 = vmatpush.msra.mxu2 %v1845_v15 }
  0x16   :  { %464 = vmatpush.msrb.mxu3 %v1826_v12  ;;  %530 = vmatpush.msrb.mxu1 %v1826_v12 }
  0x17   :  { %595 = vmatpush.msrb.mxu2 %v1821_v11 }
  0x18   :  { %465 = vmatpush.msrb.mxu3 %v1836_v14  ;;  %531 = vmatpush.msrb.mxu1 %v1836_v14 }
  0x19   :  { %596 = vmatpush.msrb.mxu2 %v1826_v12 }
  0x1a   :  { %466 = vmatpush.msrb.mxu3 %v1845_v15  ;;  %532 = vmatpush.msrb.mxu1 %v1845_v15 }
  0x1b   :  { %597 = vmatpush.msrb.mxu2 %v1836_v14 }
  0x1d   :  { %1498 = vmatmul.msk.f32.gmra.mxu0 %vm75_vm0, %v68_v9  ;;  %598 = vmatpush.msrb.mxu2 %v1845_v15 }
  0x25   :  { %1499 = vmatmul.msk.f32.gmra.mxu0 %vm75_vm0, %v69_v10 }
  0x2d   :  { %1500 = vmatmul.msk.f32.gmra.mxu0 %vm75_vm0, %v70_v16 }
  0x35   :  { %1501 = vmatmul.msk.f32.gmra.mxu0 %vm75_vm0, %v71_v18 }
  0x3d   :  { %1502 = vmatmul.msk.f32.gmra.mxu0 %vm75_vm0, %v72_v19 }
  0x45   :  { %1503 = vmatmul.msk.f32.vlgmr.msrb.gmra.mxu0 %vm150_vm1, %v141_v20 }
  0x4d   :  { %1504 = vmatmul.msk.f32.vlgmr.msra.gmra.mxu0 %vm150_vm1, %v174_v13 }
  0x65   :  { %v243_v62 = vpop.permute.xlu2 %242 }
  0x82   :  { %v117_v21 = vpop.f32.mrf.mxu0 }
  0x85   :  { %v1908_v40 = vpop.permute.xlu0 %221 }
  0x8a   :  { %v120_v22 = vpop.f32.mrf.mxu0 }
  0x92   :  { %v123_v23 = vpop.f32.mrf.mxu0 }
  0x9a   :  { %v126_v24 = vpop.f32.mrf.mxu0 }
  0xa2   :  { %v129_v25 = vpop.f32.mrf.mxu0 }
  0xaa   :  { %v132_v26 = vpop.f32.mrf.mxu0 }
  0xb2   :  { %v135_v27 = vpop.f32.mrf.mxu0 }
  0xba   :  { %v138_v28 = vpop.f32.mrf.mxu0 }
  0xc2   :  { %v171_v30 = vpop.f32.mrf.mxu0 }
  0xc3   :  { %v172_v31 = vadd.f32 %v1568_v29, %v171_v30 }
  0xc5   :  { %v175_v32 = vadd.f32 %v172_v31, %v117_v21  ;;  %v1894_v33 = vadd.f32 %v172_v31, %v120_v22  ;;  %v1896_v34 = vadd.f32 %v172_v31, %v123_v23  ;;  %v1898_v35 = vadd.f32 %v172_v31, %v126_v24 }
  0xc6   :  { %v1900_v36 = vadd.f32 %v172_v31, %v129_v25  ;;  %v1902_v37 = vadd.f32 %v172_v31, %v132_v26  ;;  %v1904_v38 = vadd.f32 %v172_v31, %v135_v27  ;;  %v1906_v39 = vadd.f32 %v172_v31, %v138_v28 }
  0xca   :  { %v196_v41 = vpop.f32.mrf.mxu0 }
  0xcb   :  { %v224_v42 = vadd.f32 %v1908_v40, %v196_v41  ;;  %v199_v43 = vadd.f32 %v196_v41, %v175_v32 }
  0xcd   :  { %226 = vrot.lane.b32.xlu0 %v224_v42, %s1695_s21  ;;  %v1505_v44 = vmul.f32 -1.442695, %v199_v43 }
  0xcf   :  { %1572 = vpow2.f32 %v1505_v44 }
  0xd5   :  { %v1573_v45 = vpop.eup %1572 }
  0xd6   :  { %v203_v46 = vadd.f32 1.0, %v1573_v45 }
  0xd8   :  { %1574 = vrcp.f32 %v203_v46  ;;  %v215_v52 = vand.u32 2147483648, %v203_v46  ;;  %vm209_vm3 = vweird.f32 %v203_v46  ;;  %v213_v53 = vand.u32 2147483647, %v203_v46 }
  0xda   :  { %v216_v55 = vor.u32 1.1754944e-38, %v215_v52  ;;  %vm214_vm5 = vcmp.eq.f32.partialorder %v213_v53, 8.507059e+37 }
  0xde   :  { %v1575_v47 = vpop.eup %1574 }
  0xdf   :  { %v205_v48 = vmul.f32 %v1575_v47, %v203_v46  ;;  %vm210_vm2 = vweird.f32 %v1575_v47 }
  0xe0   :  { %vm211_vm4 = vmor %vm209_vm3, %vm210_vm2 }
  0xe1   :  { %v206_v49 = vsub.f32 1.0, %v205_v48 }
  0xe3   :  { %v207_v50 = vmul.f32 %v1575_v47, %v206_v49 }
  0xe5   :  { %v208_v51 = vadd.f32 %v1575_v47, %v207_v50 }
  0xe7   :  { %v212_v54 = vsel %vm211_vm4, %v1575_v47, %v208_v51 }
  0xe8   :  { %v217_v56 = vsel %vm214_vm5, %v216_v55, %v212_v54 }
  0xe9   :  { %v236_v63 = vsub.f32 1.0, %v217_v56  ;;  %v245_v1 = vmul.f32 %v243_v62, %v217_v56 }
 0x13f   :  { %v227_v57 = vpop.permute.xlu0 %226 }
 0x140   :  { %v229_v58 = vmul.f32 %v227_v57, %v217_v56 }
 0x142   :  { %231 = vrot.lane.b32.xlu1 %v229_v58, %s1695_s21 }
 0x1b4   :  { %v232_v59 = vpop.permute.xlu1 %231 }
 0x1b5   :  { %v234_v60 = vadd.f32 %v232_v59, %v175_v32 }
 0x1b7   :  { %1576 = vtanh.f32 %v234_v60 }
 0x1bd   :  { %v1577_v61 = vpop.eup %1576 }
 0x1be   :  { %238 = vrot.lane.b32.xlu1 %v1577_v61, %s1696_s1 }
 0x230   :  { %v239_v0 = vpop.permute.xlu1 %238 }
 0x231   :  { %v241_v2 = vmul.f32 %v239_v0, %v236_v63 }
 0x233   :  { %v246_v3 = vadd.f32 %v245_v1, %v241_v2 }
 0x235   :  { %249 = vrot.lane.b32.xlu2 %v246_v3, %s1696_s1 }
 0x28f   :  { %v1915_v4 = vpop.permute.xlu2 %249 }
 0x290   :  { %1506 = vmatmul.msk.f32.vlgmr.msra.gmra.mxu3 %vm150_vm1, %v1915_v4 }
 0x291   :  { %661 = vmatpush.msra.mxu3 %v1821_v11 }
 0x293   :  { %662 = vmatpush.msra.mxu3 %v1826_v12 }
 0x295   :  { %663 = vmatpush.msra.mxu3 %v1836_v14 }
 0x297   :  { %664 = vmatpush.msra.mxu3 %v1845_v15 }
 0x313   :  { %v270_v5 = vpop.f32.mrf.mxu3 }
 0x314   :  { %v293_v6 = vadd.f32 %v270_v5, %v1908_v40  ;;  %v273_v7 = vadd.f32 %v270_v5, %v1894_v33 }
 0x316   :  { %295 = vrot.lane.b32.xlu0 %v293_v6, %s1695_s21  ;;  %v1507_v8 = vmul.f32 -1.442695, %v273_v7 }
 0x318   :  { %1578 = vpow2.f32 %v1507_v8 }
 0x31e   :  { %v1579_v9 = vpop.eup %1578 }
 0x31f   :  { %v277_v10 = vadd.f32 1.0, %v1579_v9 }
 0x321   :  { %1580 = vrcp.f32 %v277_v10  ;;  %v289_v14 = vand.u32 2147483648, %v277_v10  ;;  %vm283_vm7 = vweird.f32 %v277_v10  ;;  %v287_v15 = vand.u32 2147483647, %v277_v10 }
 0x323   :  { %v290_v19 = vor.u32 1.1754944e-38, %v289_v14  ;;  %vm288_vm9 = vcmp.eq.f32.partialorder %v287_v15, 8.507059e+37 }
 0x327   :  { %v1581_v13 = vpop.eup %1580 }
 0x328   :  { %v279_v11 = vmul.f32 %v1581_v13, %v277_v10  ;;  %vm284_vm6 = vweird.f32 %v1581_v13 }
 0x329   :  { %vm285_vm8 = vmor %vm283_vm7, %vm284_vm6 }
 0x32a   :  { %v280_v16 = vsub.f32 1.0, %v279_v11 }
 0x32c   :  { %v281_v12 = vmul.f32 %v1581_v13, %v280_v16 }
 0x32e   :  { %v282_v17 = vadd.f32 %v1581_v13, %v281_v12 }
 0x330   :  { %v286_v18 = vsel %vm285_vm8, %v1581_v13, %v282_v17 }
 0x331   :  { %v291_v21 = vsel %vm288_vm9, %v290_v19, %v286_v18 }
 0x332   :  { %v305_v26 = vsub.f32 1.0, %v291_v21  ;;  %v311_v28 = vmul.f32 %v291_v21, %v246_v3 }
 0x388   :  { %v296_v20 = vpop.permute.xlu0 %295 }
 0x389   :  { %v298_v22 = vmul.f32 %v296_v20, %v291_v21 }
 0x38b   :  { %300 = vrot.lane.b32.xlu1 %v298_v22, %s1695_s21 }
 0x3fd   :  { %v301_v23 = vpop.permute.xlu1 %300 }
 0x3fe   :  { %v303_v24 = vadd.f32 %v301_v23, %v1894_v33 }
 0x400   :  { %1582 = vtanh.f32 %v303_v24 }
 0x406   :  { %v1583_v25 = vpop.eup %1582 }
 0x407   :  { %307 = vrot.lane.b32.xlu2 %v1583_v25, %s1696_s1 }
 0x461   :  { %v308_v27 = vpop.permute.xlu2 %307 }
 0x462   :  { %v310_v29 = vmul.f32 %v308_v27, %v305_v26 }
 0x464   :  { %v312_v30 = vadd.f32 %v311_v28, %v310_v29 }
 0x466   :  { %315 = vrot.lane.b32.xlu0 %v312_v30, %s1696_s1 }
 0x4d8   :  { %v1930_v31 = vpop.permute.xlu0 %315 }
 0x4d9   :  { %1508 = vmatmul.msk.f32.vlgmr.msra.gmra.mxu1 %vm150_vm1, %v1930_v31 }
 0x556   :  { %v336_v32 = vpop.f32.mrf.mxu1 }
 0x557   :  { %v359_v41 = vadd.f32 %v336_v32, %v1908_v40  ;;  %v339_v33 = vadd.f32 %v336_v32, %v1896_v34 }
 0x559   :  { %361 = vrot.lane.b32.xlu1 %v359_v41, %s1695_s21  ;;  %v1509_v42 = vmul.f32 -1.442695, %v339_v33 }
 0x55b   :  { %1584 = vpow2.f32 %v1509_v42 }
 0x561   :  { %v1585_v43 = vpop.eup %1584 }
 0x562   :  { %v343_v44 = vadd.f32 1.0, %v1585_v43 }
 0x564   :  { %1586 = vrcp.f32 %v343_v44  ;;  %v355_v50 = vand.u32 2147483648, %v343_v44  ;;  %vm349_vm11 = vweird.f32 %v343_v44  ;;  %v353_v51 = vand.u32 2147483647, %v343_v44 }
 0x566   :  { %v356_v53 = vor.u32 1.1754944e-38, %v355_v50  ;;  %vm354_vm13 = vcmp.eq.f32.partialorder %v353_v51, 8.507059e+37 }
 0x56a   :  { %v1587_v45 = vpop.eup %1586 }
 0x56b   :  { %v345_v46 = vmul.f32 %v1587_v45, %v343_v44  ;;  %vm350_vm10 = vweird.f32 %v1587_v45 }
 0x56c   :  { %vm351_vm12 = vmor %vm349_vm11, %vm350_vm10 }
 0x56d   :  { %v346_v47 = vsub.f32 1.0, %v345_v46 }
 0x56f   :  { %v347_v48 = vmul.f32 %v1587_v45, %v346_v47 }
 0x571   :  { %v348_v49 = vadd.f32 %v1587_v45, %v347_v48 }
 0x573   :  { %v352_v52 = vsel %vm351_vm12, %v1587_v45, %v348_v49 }
 0x574   :  { %v357_v55 = vsel %vm354_vm13, %v356_v53, %v352_v52 }
 0x575   :  { %v371_v60 = vsub.f32 1.0, %v357_v55  ;;  %v377_v62 = vmul.f32 %v357_v55, %v312_v30 }
 0x5cb   :  { %v362_v54 = vpop.permute.xlu1 %361 }
 0x5cc   :  { %v364_v56 = vmul.f32 %v362_v54, %v357_v55 }
 0x5ce   :  { %366 = vrot.lane.b32.xlu2 %v364_v56, %s1695_s21 }
 0x628   :  { %v367_v57 = vpop.permute.xlu2 %366 }
 0x629   :  { %v369_v58 = vadd.f32 %v367_v57, %v1896_v34 }
 0x62b   :  { %1588 = vtanh.f32 %v369_v58 }
 0x631   :  { %v1589_v59 = vpop.eup %1588 }
 0x632   :  { %373 = vrot.lane.b32.xlu0 %v1589_v59, %s1696_s1 }
 0x6a4   :  { %v374_v61 = vpop.permute.xlu0 %373 }
 0x6a5   :  { %v376_v63 = vmul.f32 %v374_v61, %v371_v60 }
 0x6a7   :  { %v378_v0 = vadd.f32 %v377_v62, %v376_v63  ;;  %v1966_v62 = vld [vmem:[%s2327_s8 + $0x18] sm:$0xff]  ;;  %v1978_v63 = vld [vmem:[%s2327_s8 + $0x8] sm:$0xff] }
 0x6a8   :  { %731 = vmatpush.msra.mxu1 %v1966_v62 }
 0x6a9   :  { %381 = vrot.lane.b32.xlu1 %v378_v0, %s1696_s1 }
 0x71b   :  { %v1941_v1 = vpop.permute.xlu1 %381 }
 0x71c   :  { %1510 = vmatmul.msk.f32.vlgmr.msra.gmra.mxu2 %vm150_vm1, %v1941_v1 }
 0x79f   :  { %v402_v2 = vpop.f32.mrf.mxu2 }
 0x7a0   :  { %v425_v3 = vadd.f32 %v402_v2, %v1908_v40  ;;  %v405_v34 = vadd.f32 %v402_v2, %v1898_v35 }
 0x7a2   :  { %427 = vrot.lane.b32.xlu2 %v425_v3, %s1695_s21  ;;  %v1511_v5 = vmul.f32 -1.442695, %v405_v34 }
 0x7a4   :  { %1590 = vpow2.f32 %v1511_v5 }
 0x7aa   :  { %v1591_v6 = vpop.eup %1590 }
 0x7ab   :  { %v409_v7 = vadd.f32 1.0, %v1591_v6 }
 0x7ad   :  { %1592 = vrcp.f32 %v409_v7  ;;  %v421_v16 = vand.u32 2147483648, %v409_v7  ;;  %vm415_vm15 = vweird.f32 %v409_v7  ;;  %v419_v12 = vand.u32 2147483647, %v409_v7 }
 0x7af   :  { %v422_v14 = vor.u32 1.1754944e-38, %v421_v16  ;;  %vm420_vm2 = vcmp.eq.f32.partialorder %v419_v12, 8.507059e+37 }
 0x7b3   :  { %v1593_v8 = vpop.eup %1592 }
 0x7b4   :  { %v411_v9 = vmul.f32 %v1593_v8, %v409_v7  ;;  %vm416_vm14 = vweird.f32 %v1593_v8 }
 0x7b5   :  { %vm417_vm0 = vmor %vm415_vm15, %vm416_vm14 }
 0x7b6   :  { %v412_v10 = vsub.f32 1.0, %v411_v9 }
 0x7b8   :  { %v413_v13 = vmul.f32 %v1593_v8, %v412_v10 }
 0x7ba   :  { %v414_v11 = vadd.f32 %v1593_v8, %v413_v13 }
 0x7bc   :  { %v418_v17 = vsel %vm417_vm0, %v1593_v8, %v414_v11 }
 0x7bd   :  { %v423_v18 = vsel %vm420_vm2, %v422_v14, %v418_v17 }
 0x7be   :  { %v437_v23 = vsub.f32 1.0, %v423_v18  ;;  %v443_v25 = vmul.f32 %v423_v18, %v378_v0  ;;  %v1985_v0 = vld [vmem:[%s2327_s8] sm:$0xff] }
 0x7fc   :  { %v428_v15 = vpop.permute.xlu2 %427 }
 0x7fd   :  { %v430_v19 = vmul.f32 %v428_v15, %v423_v18 }
 0x7ff   :  { %432 = vrot.lane.b32.xlu0 %v430_v19, %s1695_s21 }
 0x871   :  { %v433_v20 = vpop.permute.xlu0 %432 }
 0x872   :  { %v435_v21 = vadd.f32 %v433_v20, %v1898_v35 }
 0x874   :  { %1594 = vtanh.f32 %v435_v21 }
 0x87a   :  { %v1595_v22 = vpop.eup %1594 }
 0x87b   :  { %439 = vrot.lane.b32.xlu1 %v1595_v22, %s1696_s1 }
 0x8ed   :  { %v440_v24 = vpop.permute.xlu1 %439 }
 0x8ee   :  { %v442_v26 = vmul.f32 %v440_v24, %v437_v23 }
 0x8f0   :  { %v444_v27 = vadd.f32 %v443_v25, %v442_v26 }
 0x8f2   :  { %447 = vrot.lane.b32.xlu2 %v444_v27, %s1696_s1 }
 0x94c   :  { %v1952_v28 = vpop.permute.xlu2 %447 }
 0x94d   :  { %1512 = vmatmul.msk.f32.vlgmr.msrb.gmra.mxu3 %vm150_vm1, %v1952_v28 }
 0x94e   :  { %822 = vmatpush.msrb.mxu3 %v1966_v62 }
 0x9d0   :  { %v468_v29 = vpop.f32.mrf.mxu3 }
 0x9d1   :  { %v491_v30 = vadd.f32 %v468_v29, %v1908_v40  ;;  %v471_v35 = vadd.f32 %v468_v29, %v1900_v36  ;;  %v2010_v29 = vld [vmem:[%s2328_s9 + $0x18] sm:$0xff] }
 0x9d2   :  { %754 = vmatpush.msra.mxu2 %v2010_v29  ;;  %1359 = vmatpush.msrb.mxu0 %v2010_v29 }
 0x9d3   :  { %493 = vrot.lane.b32.xlu0 %v491_v30, %s1695_s21  ;;  %v1513_v32 = vmul.f32 -1.442695, %v471_v35  ;;  %v2022_v30 = vld [vmem:[%s2328_s9 + $0x8] sm:$0xff]  ;;  %v2030_v35 = vld [vmem:[%s2328_s9] sm:$0xff] }
 0x9d5   :  { %1596 = vpow2.f32 %v1513_v32  ;;  %v1570_v32 = vld [vmem:[%s2330_s11] ss:$0 sm:$0xff] }
 0x9db   :  { %v1597_v41 = vpop.eup %1596 }
 0x9dc   :  { %v475_v33 = vadd.f32 1.0, %v1597_v41 }
 0x9de   :  { %1598 = vrcp.f32 %v475_v33  ;;  %v487_v47 = vand.u32 2147483648, %v475_v33  ;;  %vm481_vm4 = vweird.f32 %v475_v33  ;;  %v485_v48 = vand.u32 2147483647, %v475_v33 }
 0x9e0   :  { %v488_v50 = vor.u32 1.1754944e-38, %v487_v47  ;;  %vm486_vm6 = vcmp.eq.f32.partialorder %v485_v48, 8.507059e+37  ;;  %v2082_v47 = vld [vmem:[%s2329_s10] ss:$0 sm:$0xff]  ;;  %s1481_s10 = sshll.u32 %s2334_s15, 4  ;;  %s1482_s10 = int_to_ptr.hbm [resolvable:$true] %s1481_s10 }
 0x9e4   :  { %v1599_v42 = vpop.eup %1598 }
 0x9e5   :  { %v477_v43 = vmul.f32 %v1599_v42, %v475_v33  ;;  %vm482_vm3 = vweird.f32 %v1599_v42  ;;  %v2056_v33 = vld [vmem:[%s2321_s2 + $0x8] sm:$0xff] }
 0x9e6   :  { %vm483_vm5 = vmor %vm481_vm4, %vm482_vm3 }
 0x9e7   :  { %v478_v44 = vsub.f32 1.0, %v477_v43 }
 0x9e9   :  { %v479_v45 = vmul.f32 %v1599_v42, %v478_v44 }
 0x9eb   :  { %v480_v46 = vadd.f32 %v1599_v42, %v479_v45 }
 0x9ed   :  { %v484_v49 = vsel %vm483_vm5, %v1599_v42, %v480_v46 }
 0x9ee   :  { %v489_v52 = vsel %vm486_vm6, %v488_v50, %v484_v49 }
 0x9ef   :  { %v503_v57 = vsub.f32 1.0, %v489_v52  ;;  %v509_v59 = vmul.f32 %v489_v52, %v444_v27 }
 0xa45   :  { %v494_v51 = vpop.permute.xlu0 %493 }
 0xa46   :  { %v496_v53 = vmul.f32 %v494_v51, %v489_v52 }
 0xa48   :  { %498 = vrot.lane.b32.xlu1 %v496_v53, %s1695_s21 }
 0xaba   :  { %v499_v54 = vpop.permute.xlu1 %498 }
 0xabb   :  { %v501_v55 = vadd.f32 %v499_v54, %v1900_v36  ;;  %v1971_v36 = vld [vmem:[%s2327_s8 + $0x10] sm:$0xff] }
 0xabc   :  { %732 = vmatpush.msra.mxu1 %v1971_v36  ;;  %823 = vmatpush.msrb.mxu3 %v1971_v36 }
 0xabd   :  { %1600 = vtanh.f32 %v501_v55 }
 0xabe   :  { %733 = vmatpush.msra.mxu1 %v1978_v63  ;;  %824 = vmatpush.msrb.mxu3 %v1978_v63 }
 0xac0   :  { %734 = vmatpush.msra.mxu1 %v1985_v0  ;;  %825 = vmatpush.msrb.mxu3 %v1985_v0 }
 0xac3   :  { %v1601_v56 = vpop.eup %1600 }
 0xac4   :  { %505 = vrot.lane.b32.xlu2 %v1601_v56, %s1696_s1 }
 0xb1e   :  { %v506_v58 = vpop.permute.xlu2 %505 }
 0xb1f   :  { %v508_v60 = vmul.f32 %v506_v58, %v503_v57 }
 0xb21   :  { %v510_v61 = vadd.f32 %v509_v59, %v508_v60 }
 0xb23   :  { %513 = vrot.lane.b32.xlu0 %v510_v61, %s1696_s1 }
 0xb95   :  { %v1991_v2 = vpop.permute.xlu0 %513 }
 0xb96   :  { %1514 = vmatmul.msk.f32.vlgmr.msrb.gmra.mxu1 %vm150_vm1, %v1991_v2 }
 0xb97   :  { %847 = vmatpush.msrb.mxu1 %v2010_v29 }
 0xb9e   :  { %1521 = vmatmul.msk.f32.vlgmr.msra.gmra.mxu1 %vm150_vm1, %v1915_v4 }
 0xc13   :  { %v534_v3 = vpop.f32.mrf.mxu1 }
 0xc14   :  { %v557_v34 = vadd.f32 %v534_v3, %v1908_v40  ;;  %v537_v5 = vadd.f32 %v534_v3, %v1902_v37 }
 0xc16   :  { %559 = vrot.lane.b32.xlu1 %v557_v34, %s1695_s21  ;;  %v1515_v6 = vmul.f32 -1.442695, %v537_v5 }
 0xc18   :  { %1602 = vpow2.f32 %v1515_v6 }
 0xc1b   :  { %v736_v48 = vpop.f32.mrf.mxu1 }
 0xc1c   :  { %v737_v50 = vadd.f32 %v2082_v47, %v736_v48 }
 0xc1e   :  { %v1603_v7 = vpop.eup %1602 }
 0xc1f   :  { %v541_v8 = vadd.f32 1.0, %v1603_v7 }
 0xc21   :  { %1604 = vrcp.f32 %v541_v8  ;;  %v553_v12 = vand.u32 2147483648, %v541_v8  ;;  %vm547_vm8 = vweird.f32 %v541_v8  ;;  %v551_v4 = vand.u32 2147483647, %v541_v8 }
 0xc23   :  { %v554_v14 = vor.u32 1.1754944e-38, %v553_v12  ;;  %vm552_vm10 = vcmp.eq.f32.partialorder %v551_v4, 8.507059e+37 }
 0xc27   :  { %v1605_v9 = vpop.eup %1604 }
 0xc28   :  { %v543_v10 = vmul.f32 %v1605_v9, %v541_v8  ;;  %vm548_vm7 = vweird.f32 %v1605_v9 }
 0xc29   :  { %vm549_vm9 = vmor %vm547_vm8, %vm548_vm7 }
 0xc2a   :  { %v544_v13 = vsub.f32 1.0, %v543_v10 }
 0xc2c   :  { %v545_v11 = vmul.f32 %v1605_v9, %v544_v13 }
 0xc2e   :  { %v546_v16 = vadd.f32 %v1605_v9, %v545_v11 }
 0xc30   :  { %v550_v17 = vsel %vm549_vm9, %v1605_v9, %v546_v16 }
 0xc31   :  { %v555_v18 = vsel %vm552_vm10, %v554_v14, %v550_v17 }
 0xc32   :  { %v569_v23 = vsub.f32 1.0, %v555_v18  ;;  %v575_v25 = vmul.f32 %v555_v18, %v510_v61 }
 0xc88   :  { %v560_v15 = vpop.permute.xlu1 %559 }
 0xc89   :  { %v562_v19 = vmul.f32 %v560_v15, %v555_v18 }
 0xc8b   :  { %564 = vrot.lane.b32.xlu2 %v562_v19, %s1695_s21 }
 0xc93   :  { %784 = vrot.lane.b32.xlu2 %v1570_v32, %s1695_s21 }
 0xce5   :  { %v565_v20 = vpop.permute.xlu2 %564 }
 0xce6   :  { %v567_v21 = vadd.f32 %v565_v20, %v1902_v37  ;;  %v2015_v37 = vld [vmem:[%s2328_s9 + $0x10] sm:$0xff] }
 0xce7   :  { %755 = vmatpush.msra.mxu2 %v2015_v37  ;;  %848 = vmatpush.msrb.mxu1 %v2015_v37 }
 0xce8   :  { %1606 = vtanh.f32 %v567_v21  ;;  %1360 = vmatpush.msrb.mxu0 %v2015_v37 }
 0xce9   :  { %756 = vmatpush.msra.mxu2 %v2022_v30  ;;  %849 = vmatpush.msrb.mxu1 %v2022_v30 }
 0xcea   :  { %1361 = vmatpush.msrb.mxu0 %v2022_v30 }
 0xceb   :  { %757 = vmatpush.msra.mxu2 %v2030_v35  ;;  %850 = vmatpush.msrb.mxu1 %v2030_v35 }
 0xcec   :  { %1362 = vmatpush.msrb.mxu0 %v2030_v35 }
 0xced   :  { %992 = vmatpush.msra.mxu1 %v1966_v62  ;;  %v2074_v44 = vpop.permute.xlu2 %784 }
 0xcee   :  { %v1607_v22 = vpop.eup %1606 }
 0xcef   :  { %571 = vrot.lane.b32.xlu0 %v1607_v22, %s1696_s1  ;;  %993 = vmatpush.msra.mxu1 %v1971_v36 }
 0xcf1   :  { %994 = vmatpush.msra.mxu1 %v1978_v63 }
 0xcf3   :  { %995 = vmatpush.msra.mxu1 %v1985_v0 }
 0xd61   :  { %v572_v24 = vpop.permute.xlu0 %571 }
 0xd62   :  { %v574_v26 = vmul.f32 %v572_v24, %v569_v23 }
 0xd64   :  { %v2003_v27 = vadd.f32 %v575_v25, %v574_v26 }
 0xd66   :  { %579 = vrot.lane.b32.xlu1 %v2003_v27, %s1696_s1 }
 0xdd8   :  { %v2047_v41 = vpop.permute.xlu1 %579 }
 0xdd9   :  { %1516 = vmatmul.msk.f32.vlgmr.msrb.gmra.mxu2 %vm150_vm1, %v2047_v41 }
 0xdda   :  { %907 = vmatpush.msrb.mxu2 %v1966_v62 }
 0xddc   :  { %908 = vmatpush.msrb.mxu2 %v1971_v36 }
 0xdde   :  { %909 = vmatpush.msrb.mxu2 %v1978_v63 }
 0xde0   :  { %910 = vmatpush.msrb.mxu2 %v1985_v0 }
 0xde1   :  { %1522 = vmatmul.msk.f32.vlgmr.msra.gmra.mxu2 %vm150_vm1, %v2056_v33 }
 0xde2   :  { %1017 = vmatpush.msra.mxu2 %v2010_v29 }
 0xde4   :  { %1018 = vmatpush.msra.mxu2 %v2015_v37 }
 0xde6   :  { %1019 = vmatpush.msra.mxu2 %v2022_v30 }
 0xde8   :  { %1020 = vmatpush.msra.mxu2 %v2030_v35 }
 0xde9   :  { %1527 = vmatmul.msk.f32.vlgmr.msrb.gmra.mxu2 %vm150_vm1, %v1941_v1 }
 0xdea   :  { %1162 = vmatpush.msrb.mxu2 %v1966_v62 }
 0xdec   :  { %1163 = vmatpush.msrb.mxu2 %v1971_v36 }
 0xdee   :  { %1164 = vmatpush.msrb.mxu2 %v1978_v63 }
 0xdf0   :  { %1165 = vmatpush.msrb.mxu2 %v1985_v0 }
 0xe5c   :  { %v600_v42 = vpop.f32.mrf.mxu2 }
 0xe5d   :  { %v623_v43 = vadd.f32 %v600_v42, %v1908_v40  ;;  %v603_v1 = vadd.f32 %v600_v42, %v1904_v38 }
 0xe5f   :  { %625 = vrot.lane.b32.xlu0 %v623_v43, %s1695_s21  ;;  %v1517_v49 = vmul.f32 -1.442695, %v603_v1 }
 0xe61   :  { %1608 = vpow2.f32 %v1517_v49 }
 0xe64   :  { %v759_v45 = vpop.f32.mrf.mxu2 }
 0xe65   :  { %v787_v46 = vadd.f32 %v2074_v44, %v759_v45  ;;  %v762_v51 = vadd.f32 %v759_v45, %v737_v50 }
 0xe67   :  { %789 = vrot.lane.b32.xlu1 %v787_v46, %s1695_s21  ;;  %v1523_v52 = vmul.f32 -1.442695, %v762_v51  ;;  %v1609_v53 = vpop.eup %1608 }
 0xe68   :  { %v607_v54 = vadd.f32 1.0, %v1609_v53 }
 0xe69   :  { %1610 = vpow2.f32 %v1523_v52 }
 0xe6a   :  { %1612 = vrcp.f32 %v607_v54  ;;  %v619_v6 = vand.u32 2147483648, %v607_v54  ;;  %vm613_vm12 = vweird.f32 %v607_v54  ;;  %v617_v7 = vand.u32 2147483647, %v607_v54 }
 0xe6c   :  { %v620_v10 = vor.u32 1.1754944e-38, %v619_v6  ;;  %vm618_vm14 = vcmp.eq.f32.partialorder %v617_v7, 8.507059e+37 }
 0xe6f   :  { %v1611_v55 = vpop.eup %1610 }
 0xe70   :  { %v766_v56 = vadd.f32 1.0, %v1611_v55  ;;  %v1613_v57 = vpop.eup %1612 }
 0xe71   :  { %v609_v58 = vmul.f32 %v1613_v57, %v607_v54  ;;  %vm614_vm11 = vweird.f32 %v1613_v57 }
 0xe72   :  { %1614 = vrcp.f32 %v766_v56  ;;  %vm615_vm13 = vmor %vm613_vm12, %vm614_vm11  ;;  %v778_v4 = vand.u32 2147483648, %v766_v56  ;;  %vm772_vm0 = vweird.f32 %v766_v56  ;;  %v776_v17 = vand.u32 2147483647, %v766_v56 }
 0xe73   :  { %v610_v59 = vsub.f32 1.0, %v609_v58 }
 0xe74   :  { %v779_v15 = vor.u32 1.1754944e-38, %v778_v4  ;;  %vm777_vm3 = vcmp.eq.f32.partialorder %v776_v17, 8.507059e+37 }
 0xe75   :  { %v611_v61 = vmul.f32 %v1613_v57, %v610_v59 }
 0xe77   :  { %v612_v34 = vadd.f32 %v1613_v57, %v611_v61 }
 0xe78   :  { %v1615_v60 = vpop.eup %1614 }
 0xe79   :  { %v768_v3 = vmul.f32 %v1615_v60, %v766_v56  ;;  %v616_v8 = vsel %vm615_vm13, %v1613_v57, %v612_v34  ;;  %vm773_vm15 = vweird.f32 %v1615_v60 }
 0xe7a   :  { %v621_v11 = vsel %vm618_vm14, %v620_v10, %v616_v8  ;;  %vm774_vm2 = vmor %vm772_vm0, %vm773_vm15  ;;  %vm1464_vm0 = vcmask 326656  }
 0xe7b   :  { %v769_v5 = vsub.f32 1.0, %v768_v3  ;;  %v635_v32 = vsub.f32 1.0, %v621_v11  ;;  %v641_v43 = vmul.f32 %v621_v11, %v2003_v27 }
 0xe7d   :  { %v770_v9 = vmul.f32 %v1615_v60, %v769_v5 }
 0xe7f   :  { %v771_v12 = vadd.f32 %v1615_v60, %v770_v9 }
 0xe81   :  { %v775_v14 = vsel %vm774_vm2, %v1615_v60, %v771_v12 }
 0xe82   :  { %v780_v18 = vsel %vm777_vm3, %v779_v15, %v775_v14 }
 0xed1   :  { %v626_v13 = vpop.permute.xlu0 %625 }
 0xed2   :  { %v628_v16 = vmul.f32 %v626_v13, %v621_v11 }
 0xed4   :  { %630 = vrot.lane.b32.xlu2 %v628_v16, %s1695_s21 }
 0xed9   :  { %v790_v19 = vpop.permute.xlu1 %789 }
 0xeda   :  { %v792_v20 = vmul.f32 %v790_v19, %v780_v18 }
 0xedc   :  { %794 = vrot.lane.b32.xlu0 %v792_v20, %s1695_s21 }
 0xee4   :  { %805 = vrot.lane.b32.xlu0 %v2056_v33, %s1694_s30  ;;  %v799_v33 = vsub.f32 1.0, %v780_v18  ;;  %s1698_s30 = smov 128  }
 0xf2e   :  { %v631_v21 = vpop.permute.xlu2 %630 }
 0xf2f   :  { %v633_v22 = vadd.f32 %v631_v21, %v1904_v38 }
 0xf31   :  { %1616 = vtanh.f32 %v633_v22  ;;  %v912_v22 = vpop.f32.mrf.mxu2 }
 0xf37   :  { %v1617_v23 = vpop.eup %1616 }
 0xf38   :  { %637 = vrot.lane.b32.xlu1 %v1617_v23, %s1696_s1  ;;  %v913_v23 = vadd.f32 %v2082_v47, %v912_v22  ;;  %v2176_v22 = vld [vmem:[%s2331_s12 + $0x18] sm:$0xff] }
 0xf4e   :  { %v795_v24 = vpop.permute.xlu0 %794 }
 0xf4f   :  { %v797_v25 = vadd.f32 %v795_v24, %v737_v50 }
 0xf51   :  { %1618 = vtanh.f32 %v797_v25 }
 0xf56   :  { %v806_v38 = vpop.permute.xlu0 %805 }
 0xf57   :  { %v1619_v26 = vpop.eup %1618  ;;  %v808_v48 = vmul.f32 %v806_v38, %v780_v18 }
 0xf58   :  { %801 = vrot.lane.b32.xlu2 %v1619_v26, %s1696_s1 }
 0xfaa   :  { %v638_v42 = vpop.permute.xlu1 %637 }
 0xfab   :  { %v640_v45 = vmul.f32 %v638_v42, %v635_v32 }
 0xfad   :  { %v2093_v46 = vadd.f32 %v641_v43, %v640_v45 }
 0xfaf   :  { %645 = vrot.lane.b32.xlu1 %v2093_v46, %s1696_s1 }
 0xfb2   :  { %v802_v1 = vpop.permute.xlu2 %801 }
 0xfb3   :  { %v804_v49 = vmul.f32 %v802_v1, %v799_v33 }
 0xfb5   :  { %v809_v50 = vadd.f32 %v808_v48, %v804_v49 }
 0xfb7   :  { %831 = vrot.lane.b32.xlu2 %v809_v50, %s1696_s1 }
0x1011   :  { %v2098_v51 = vpop.permute.xlu2 %831 }
0x1012   :  { %1525 = vmatmul.msk.f32.vlgmr.msrb.gmra.mxu1 %vm150_vm1, %v2098_v51 }
0x1013   :  { %1102 = vmatpush.msrb.mxu1 %v2010_v29 }
0x1015   :  { %1103 = vmatpush.msrb.mxu1 %v2015_v37 }
0x1017   :  { %1104 = vmatpush.msrb.mxu1 %v2022_v30 }
0x1019   :  { %1105 = vmatpush.msrb.mxu1 %v2030_v35 }
0x101a   :  { %1530 = vmatmul.msk.f32.vlgmr.msra.gmra.mxu1 %vm150_vm1, %v1952_v28 }
0x101b   :  { %1247 = vmatpush.msra.mxu1 %v1966_v62 }
0x101d   :  { %1248 = vmatpush.msra.mxu1 %v1971_v36 }
0x101f   :  { %1249 = vmatpush.msra.mxu1 %v1978_v63 }
0x1021   :  { %v2111_v27 = vpop.permute.xlu1 %645  ;;  %1250 = vmatpush.msra.mxu1 %v1985_v0 }
0x1022   :  { %1518 = vmatmul.msk.f32.vlgmr.msra.gmra.mxu3 %vm150_vm1, %v2111_v27 }
0x1023   :  { %932 = vmatpush.msra.mxu3 %v2010_v29 }
0x1025   :  { %933 = vmatpush.msra.mxu3 %v2015_v37 }
0x1027   :  { %934 = vmatpush.msra.mxu3 %v2022_v30 }
0x1029   :  { %935 = vmatpush.msra.mxu3 %v2030_v35 }
0x102a   :  { %1524 = vmatmul.msk.f32.vlgmr.msrb.gmra.mxu3 %vm150_vm1, %v1930_v31 }
0x102b   :  { %1077 = vmatpush.msrb.mxu3 %v1966_v62 }
0x102d   :  { %1078 = vmatpush.msrb.mxu3 %v1971_v36 }
0x102f   :  { %1079 = vmatpush.msrb.mxu3 %v1978_v63 }
0x1031   :  { %1080 = vmatpush.msrb.mxu3 %v1985_v0 }
0x108f   :  { %v852_v28 = vpop.f32.mrf.mxu1 }
0x1090   :  { %v875_v52 = vadd.f32 %v852_v28, %v2074_v44 }
0x1092   :  { %877 = vrot.lane.b32.xlu0 %v875_v52, %s1695_s21 }
0x10a5   :  { %v2128_v53 = vpop.f32.mrf.mxu3 }
0x10ad   :  { %v827_v54 = vpop.f32.mrf.mxu3 }
0x10ae   :  { %v828_v55 = vadd.f32 %v2082_v47, %v827_v54 }
0x10b0   :  { %v855_v56 = vadd.f32 %v852_v28, %v828_v55 }
0x10b2   :  { %v1526_v31 = vmul.f32 -1.442695, %v855_v56 }
0x10b4   :  { %1620 = vpow2.f32 %v1526_v31 }
0x10ba   :  { %v1621_v57 = vpop.eup %1620 }
0x10bb   :  { %v859_v58 = vadd.f32 1.0, %v1621_v57 }
0x10bd   :  { %1622 = vrcp.f32 %v859_v58  ;;  %v871_v5 = vand.u32 2147483648, %v859_v58  ;;  %vm865_vm5 = vweird.f32 %v859_v58  ;;  %v869_v6 = vand.u32 2147483647, %v859_v58 }
0x10bf   :  { %v872_v8 = vor.u32 1.1754944e-38, %v871_v5  ;;  %vm870_vm7 = vcmp.eq.f32.partialorder %v869_v6, 8.507059e+37 }
0x10c3   :  { %v1623_v59 = vpop.eup %1622 }
0x10c4   :  { %v861_v60 = vmul.f32 %v1623_v59, %v859_v58  ;;  %vm866_vm4 = vweird.f32 %v1623_v59 }
0x10c5   :  { %vm867_vm6 = vmor %vm865_vm5, %vm866_vm4 }
0x10c6   :  { %v862_v61 = vsub.f32 1.0, %v861_v60  ;;  %v997_v60 = vpop.f32.mrf.mxu1 }
0x10c8   :  { %v863_v3 = vmul.f32 %v1623_v59, %v862_v61  ;;  %v998_v61 = vadd.f32 %v2082_v47, %v997_v60 }
0x10ca   :  { %v864_v34 = vadd.f32 %v1623_v59, %v863_v3 }
0x10cc   :  { %v868_v7 = vsel %vm867_vm6, %v1623_v59, %v864_v34 }
0x10cd   :  { %v873_v10 = vsel %vm870_vm7, %v872_v8, %v868_v7 }
0x10ce   :  { %v887_v4 = vsub.f32 1.0, %v873_v10  ;;  %v893_v14 = vmul.f32 %v873_v10, %v809_v50 }
0x1104   :  { %v878_v9 = vpop.permute.xlu0 %877 }
0x1105   :  { %v880_v13 = vmul.f32 %v878_v9, %v873_v10 }
0x1107   :  { %882 = vrot.lane.b32.xlu1 %v880_v13, %s1695_s21 }
0x1179   :  { %v883_v11 = vpop.permute.xlu1 %882 }
0x117a   :  { %v885_v16 = vadd.f32 %v883_v11, %v828_v55 }
0x117c   :  { %1624 = vtanh.f32 %v885_v16 }
0x1182   :  { %v1625_v12 = vpop.eup %1624 }
0x1183   :  { %889 = vrot.lane.b32.xlu2 %v1625_v12, %s1696_s1 }
0x11dd   :  { %v890_v17 = vpop.permute.xlu2 %889 }
0x11de   :  { %v892_v15 = vmul.f32 %v890_v17, %v887_v4 }
0x11e0   :  { %v894_v18 = vadd.f32 %v893_v14, %v892_v15 }
0x11e2   :  { %916 = vrot.lane.b32.xlu0 %v894_v18, %s1696_s1 }
0x1254   :  { %v2134_v19 = vpop.permute.xlu0 %916 }
0x1255   :  { %1528 = vmatmul.msk.f32.vlgmr.msra.gmra.mxu3 %vm150_vm1, %v2134_v19 }
0x1256   :  { %1187 = vmatpush.msra.mxu3 %v2010_v29 }
0x1258   :  { %1188 = vmatpush.msra.mxu3 %v2015_v37 }
0x125a   :  { %1189 = vmatpush.msra.mxu3 %v2022_v30 }
0x125c   :  { %1190 = vmatpush.msra.mxu3 %v2030_v35 }
0x125d   :  { %1533 = vmatmul.msk.f32.vlgmr.msrb.gmra.mxu3 %vm150_vm1, %v1991_v2 }
0x125e   :  { %1334 = vmatpush.msrb.mxu3 %v1966_v62 }
0x1260   :  { %1335 = vmatpush.msrb.mxu3 %v1971_v36 }
0x1262   :  { %1336 = vmatpush.msrb.mxu3 %v1978_v63 }
0x1264   :  { %1337 = vmatpush.msrb.mxu3 %v1985_v0 }
0x12d8   :  { %v937_v20 = vpop.f32.mrf.mxu3 }
0x12d9   :  { %v960_v21 = vadd.f32 %v937_v20, %v2074_v44  ;;  %v940_v24 = vadd.f32 %v937_v20, %v913_v23 }
0x12db   :  { %962 = vrot.lane.b32.xlu1 %v960_v21, %s1695_s21  ;;  %v1529_v25 = vmul.f32 -1.442695, %v940_v24  ;;  %v2188_v24 = vld [vmem:[%s2331_s12 + $0x8] sm:$0xff] }
0x12dd   :  { %1626 = vpow2.f32 %v1529_v25  ;;  %v2194_v25 = vld [vmem:[%s2331_s12] sm:$0xff] }
0x12e3   :  { %v1627_v2 = vpop.eup %1626 }
0x12e4   :  { %v944_v26 = vadd.f32 1.0, %v1627_v2 }
0x12e6   :  { %1628 = vrcp.f32 %v944_v26  ;;  %v956_v0 = vand.u32 2147483648, %v944_v26  ;;  %vm950_vm9 = vweird.f32 %v944_v26  ;;  %v954_v43 = vand.u32 2147483647, %v944_v26 }
0x12e8   :  { %v957_v38 = vor.u32 1.1754944e-38, %v956_v0  ;;  %vm955_vm11 = vcmp.eq.f32.partialorder %v954_v43, 8.507059e+37  ;;  %v1082_v43 = vpop.f32.mrf.mxu3 }
0x12ec   :  { %v1629_v62 = vpop.eup %1628 }
0x12ed   :  { %v946_v36 = vmul.f32 %v1629_v62, %v944_v26  ;;  %vm951_vm8 = vweird.f32 %v1629_v62 }
0x12ee   :  { %vm952_vm10 = vmor %vm950_vm9, %vm951_vm8 }
0x12ef   :  { %v947_v32 = vsub.f32 1.0, %v946_v36 }
0x12f1   :  { %v948_v63 = vmul.f32 %v1629_v62, %v947_v32 }
0x12f3   :  { %v949_v42 = vadd.f32 %v1629_v62, %v948_v63 }
0x12f5   :  { %v953_v45 = vsel %vm952_vm10, %v1629_v62, %v949_v42 }
0x12f6   :  { %v958_v1 = vsel %vm955_vm11, %v957_v38, %v953_v45  ;;  %v1083_v45 = vadd.f32 %v2082_v47, %v1082_v43 }
0x12f7   :  { %v972_v52 = vsub.f32 1.0, %v958_v1  ;;  %v978_v55 = vmul.f32 %v958_v1, %v894_v18 }
0x134d   :  { %v963_v33 = vpop.permute.xlu1 %962 }
0x134e   :  { %v965_v48 = vmul.f32 %v963_v33, %v958_v1 }
0x1350   :  { %967 = vrot.lane.b32.xlu2 %v965_v48, %s1695_s21 }
0x13aa   :  { %v968_v49 = vpop.permute.xlu2 %967 }
0x13ab   :  { %v970_v50 = vadd.f32 %v968_v49, %v913_v23  ;;  %v2182_v23 = vld [vmem:[%s2331_s12 + $0x10] sm:$0xff] }
0x13ad   :  { %1630 = vtanh.f32 %v970_v50 }
0x13b3   :  { %v1631_v28 = vpop.eup %1630 }
0x13b4   :  { %974 = vrot.lane.b32.xlu0 %v1631_v28, %s1696_s1 }
0x1426   :  { %v975_v54 = vpop.permute.xlu0 %974 }
0x1427   :  { %v977_v56 = vmul.f32 %v975_v54, %v972_v52 }
0x1429   :  { %v979_v31 = vadd.f32 %v978_v55, %v977_v56 }
0x142b   :  { %1001 = vrot.lane.b32.xlu1 %v979_v31, %s1696_s1 }
0x149d   :  { %v2154_v57 = vpop.permute.xlu1 %1001 }
0x149e   :  { %1531 = vmatmul.msk.f32.vlgmr.msra.gmra.mxu2 %vm150_vm1, %v2154_v57 }
0x149f   :  { %1272 = vmatpush.msra.mxu2 %v2010_v29 }
0x14a1   :  { %1273 = vmatpush.msra.mxu2 %v2015_v37 }
0x14a3   :  { %1274 = vmatpush.msra.mxu2 %v2022_v30 }
0x14a5   :  { %1275 = vmatpush.msra.mxu2 %v2030_v35 }
0x14a6   :  { %1536 = vmatmul.msk.f32.vlgmr.msrb.gmra.mxu2 %vm150_vm1, %v2047_v41 }
0x14a7   :  { %1553 = vmatpush.msrb.mxu2 %v2176_v22 }
0x14a9   :  { %1555 = vmatpush.msrb.mxu2 %v2182_v23 }
0x14ab   :  { %1557 = vmatpush.msrb.mxu2 %v2188_v24 }
0x14ad   :  { %1559 = vmatpush.msrb.mxu2 %v2194_v25 }
0x1521   :  { %v1022_v58 = vpop.f32.mrf.mxu2 }
0x1522   :  { %v1045_v59 = vadd.f32 %v1022_v58, %v2074_v44  ;;  %v1025_v3 = vadd.f32 %v1022_v58, %v998_v61 }
0x1524   :  { %1047 = vrot.lane.b32.xlu2 %v1045_v59, %s1695_s21  ;;  %v1532_v34 = vmul.f32 -1.442695, %v1025_v3 }
0x1526   :  { %1632 = vpow2.f32 %v1532_v34 }
0x152c   :  { %v1633_v29 = vpop.eup %1632 }
0x152d   :  { %v1029_v37 = vadd.f32 1.0, %v1633_v29 }
0x152f   :  { %1634 = vrcp.f32 %v1029_v37  ;;  %v1041_v41 = vand.u32 2147483648, %v1029_v37  ;;  %vm1035_vm13 = vweird.f32 %v1029_v37  ;;  %v1039_v8 = vand.u32 2147483647, %v1029_v37 }
0x1531   :  { %v1042_v10 = vor.u32 1.1754944e-38, %v1041_v41  ;;  %vm1040_vm15 = vcmp.eq.f32.partialorder %v1039_v8, 8.507059e+37  ;;  %v1167_v8 = vpop.f32.mrf.mxu2 }
0x1535   :  { %v1635_v30 = vpop.eup %1634 }
0x1536   :  { %v1031_v5 = vmul.f32 %v1635_v30, %v1029_v37  ;;  %vm1036_vm12 = vweird.f32 %v1635_v30 }
0x1537   :  { %vm1037_vm14 = vmor %vm1035_vm13, %vm1036_vm12 }
0x1538   :  { %v1032_v35 = vsub.f32 1.0, %v1031_v5 }
0x153a   :  { %v1033_v6 = vmul.f32 %v1635_v30, %v1032_v35 }
0x153c   :  { %v1034_v7 = vadd.f32 %v1635_v30, %v1033_v6 }
0x153e   :  { %v1038_v9 = vsel %vm1037_vm14, %v1635_v30, %v1034_v7 }
0x153f   :  { %v1043_v11 = vsel %vm1040_vm15, %v1042_v10, %v1038_v9  ;;  %v1168_v9 = vadd.f32 %v2082_v47, %v1167_v8 }
0x1540   :  { %v1057_v14 = vsub.f32 1.0, %v1043_v11  ;;  %v1063_v18 = vmul.f32 %v1043_v11, %v979_v31 }
0x157e   :  { %v1048_v13 = vpop.permute.xlu2 %1047 }
0x157f   :  { %v1050_v16 = vmul.f32 %v1048_v13, %v1043_v11 }
0x1581   :  { %1052 = vrot.lane.b32.xlu0 %v1050_v16, %s1695_s21 }
0x15f3   :  { %v1053_v12 = vpop.permute.xlu0 %1052 }
0x15f4   :  { %v1055_v4 = vadd.f32 %v1053_v12, %v998_v61 }
0x15f6   :  { %1636 = vtanh.f32 %v1055_v4 }
0x15fc   :  { %v1637_v17 = vpop.eup %1636 }
0x15fd   :  { %1059 = vrot.lane.b32.xlu1 %v1637_v17, %s1696_s1 }
0x166f   :  { %v1060_v15 = vpop.permute.xlu1 %1059 }
0x1670   :  { %v1062_v20 = vmul.f32 %v1060_v15, %v1057_v14 }
0x1672   :  { %v2169_v21 = vadd.f32 %v1063_v18, %v1062_v20 }
0x1674   :  { %1086 = vrot.lane.b32.xlu2 %v2169_v21, %s1696_s1 }
0x16ce   :  { %v2197_v2 = vpop.permute.xlu2 %1086 }
0x16cf   :  { %1534 = vmatmul.msk.f32.vlgmr.msrb.gmra.mxu1 %vm150_vm1, %v2197_v2 }
0x16d0   :  { %1435 = vmatpush.msrb.mxu1 %v2176_v22 }
0x16d2   :  { %1436 = vmatpush.msrb.mxu1 %v2182_v23 }
0x16d4   :  { %1437 = vmatpush.msrb.mxu1 %v2188_v24 }
0x16d6   :  { %1438 = vmatpush.msrb.mxu1 %v2194_v25 }
0x16d7   :  { %1539 = vmatmul.msk.f32.vlgmr.msra.gmra.mxu1 %vm150_vm1, %v2111_v27  ;;  %v2220_v27 = vld [vmem:[%s2332_s13] ss:$0 sm:$0xff] }
0x16df   :  { %1545 = vmatmul.msk.f32.vlgmr.msrb.gmra.mxu1 %vm150_vm1, %v2098_v51 }
0x16e7   :  { %1546 = vmatmul.msk.f32.gmra.mxu1 %vm150_vm1, %v2134_v19 }
0x16ef   :  { %1547 = vmatmul.msk.f32.gmra.mxu1 %vm150_vm1, %v2154_v57 }
0x174c   :  { %v1107_v26 = vpop.f32.mrf.mxu1 }
0x174d   :  { %v1130_v62 = vadd.f32 %v1107_v26, %v2074_v44  ;;  %v1110_v38 = vadd.f32 %v1107_v26, %v1083_v45 }
0x174f   :  { %1132 = vrot.lane.b32.xlu0 %v1130_v62, %s1695_s21  ;;  %v1535_v33 = vmul.f32 -1.442695, %v1110_v38 }
0x1751   :  { %1638 = vpow2.f32 %v1535_v33 }
0x1754   :  { %v2215_v36 = vpop.f32.mrf.mxu1 }
0x1757   :  { %v1639_v1 = vpop.eup %1638 }
0x1758   :  { %v1114_v48 = vadd.f32 1.0, %v1639_v1 }
0x175a   :  { %1640 = vrcp.f32 %v1114_v48  ;;  %v1126_v55 = vand.u32 2147483648, %v1114_v48  ;;  %vm1120_vm3 = vweird.f32 %v1114_v48  ;;  %v1124_v56 = vand.u32 2147483647, %v1114_v48 }
0x175c   :  { %v1440_v32 = vpop.f32.mrf.mxu1  ;;  %v1127_v57 = vor.u32 1.1754944e-38, %v1126_v55  ;;  %vm1125_vm5 = vcmp.eq.f32.partialorder %v1124_v56, 8.507059e+37 }
0x175d   :  { %v1441_v51 = vadd.f32 %v2220_v27, %v1440_v32 }
0x175f   :  { %1465 = vst.msk [vmem:[%s2333_s14] sm:$0xff] %vm1464_vm0, %v1441_v51  ;;  %v689_v51 = vadd.f32 %v2128_v53, %v1908_v40  ;;  %v669_v40 = vadd.f32 %v2128_v53, %v1906_v39 }
0x1760   :  { %v1641_v49 = vpop.eup %1640 }
0x1761   :  { %v1116_v50 = vmul.f32 %v1641_v49, %v1114_v48  ;;  %vm1121_vm2 = vweird.f32 %v1641_v49  ;;  %v1519_v38 = vmul.f32 -1.442695, %v669_v40 }
0x1762   :  { %vm1122_vm4 = vmor %vm1120_vm3, %vm1121_vm2 }
0x1763   :  { %v1117_v28 = vsub.f32 1.0, %v1116_v50 }
0x1764   :  { %v1443_v19 = vpop.f32.mrf.mxu1 }
0x1765   :  { %v1444_v63 = vadd.f32 %v2220_v27, %v1443_v19  ;;  %v1118_v52 = vmul.f32 %v1641_v49, %v1117_v28 }
0x1767   :  { %1466 = vst.msk [vmem:[%s2333_s14 + $0x8] sm:$0xff] %vm1464_vm0, %v1444_v63  ;;  %v1119_v54 = vadd.f32 %v1641_v49, %v1118_v52 }
0x1769   :  { %v1123_v31 = vsel %vm1122_vm4, %v1641_v49, %v1119_v54 }
0x176a   :  { %v1128_v59 = vsel %vm1125_vm5, %v1127_v57, %v1123_v31 }
0x176b   :  { %v1142_v29 = vsub.f32 1.0, %v1128_v59  ;;  %v1148_v30 = vmul.f32 %v1128_v59, %v2169_v21 }
0x176c   :  { %v1446_v42 = vpop.f32.mrf.mxu1 }
0x176d   :  { %v1447_v0 = vadd.f32 %v2220_v27, %v1446_v42 }
0x176f   :  { %1467 = vst.msk [vmem:[%s2333_s14 + $0x10] sm:$0xff] %vm1464_vm0, %v1447_v0 }
0x17c1   :  { %v1133_v58 = vpop.permute.xlu0 %1132 }
0x17c2   :  { %v1135_v60 = vmul.f32 %v1133_v58, %v1128_v59 }
0x17c4   :  { %1137 = vrot.lane.b32.xlu1 %v1135_v60, %s1695_s21 }
0x1836   :  { %v1138_v61 = vpop.permute.xlu1 %1137 }
0x1837   :  { %v1140_v3 = vadd.f32 %v1138_v61, %v1083_v45 }
0x1839   :  { %1642 = vtanh.f32 %v1140_v3 }
0x183f   :  { %v1643_v34 = vpop.eup %1642 }
0x1840   :  { %1144 = vrot.lane.b32.xlu2 %v1643_v34, %s1696_s1 }
0x189a   :  { %v1145_v37 = vpop.permute.xlu2 %1144 }
0x189b   :  { %v1147_v5 = vmul.f32 %v1145_v37, %v1142_v29 }
0x189d   :  { %v1149_v35 = vadd.f32 %v1148_v30, %v1147_v5  ;;  %v1253_v30 = vadd.f32 %v2082_v47, %v2215_v36 }
0x189f   :  { %1171 = vrot.lane.b32.xlu0 %v1149_v35, %s1696_s1 }
0x1911   :  { %v1172_v6 = vpop.permute.xlu0 %1171 }
0x1912   :  { %1537 = vmatmul.msk.f32.vlgmr.msra.gmra.mxu3 %vm150_vm1, %v1172_v6 }
0x1913   :  { %1554 = vmatpush.msra.mxu3 %v2176_v22 }
0x1915   :  { %1556 = vmatpush.msra.mxu3 %v2182_v23 }
0x1917   :  { %1558 = vmatpush.msra.mxu3 %v2188_v24 }
0x1919   :  { %1560 = vmatpush.msra.mxu3 %v2194_v25 }
0x1995   :  { %v1192_v7 = vpop.f32.mrf.mxu3 }
0x1996   :  { %v1215_v41 = vadd.f32 %v1192_v7, %v2074_v44  ;;  %v1195_v10 = vadd.f32 %v1192_v7, %v1168_v9 }
0x1998   :  { %1217 = vrot.lane.b32.xlu1 %v1215_v41, %s1695_s21  ;;  %v1538_v13 = vmul.f32 -1.442695, %v1195_v10 }
0x199a   :  { %1644 = vpow2.f32 %v1538_v13 }
0x19a0   :  { %v1645_v11 = vpop.eup %1644 }
0x19a1   :  { %v1199_v16 = vadd.f32 1.0, %v1645_v11 }
0x19a3   :  { %1646 = vrcp.f32 %v1199_v16  ;;  %v1211_v18 = vand.u32 2147483648, %v1199_v16  ;;  %vm1205_vm7 = vweird.f32 %v1199_v16  ;;  %v1209_v20 = vand.u32 2147483647, %v1199_v16 }
0x19a5   :  { %v1212_v22 = vor.u32 1.1754944e-38, %v1211_v18  ;;  %vm1210_vm9 = vcmp.eq.f32.partialorder %v1209_v20, 8.507059e+37 }
0x19a9   :  { %v1647_v12 = vpop.eup %1646 }
0x19aa   :  { %v1201_v4 = vmul.f32 %v1647_v12, %v1199_v16  ;;  %vm1206_vm6 = vweird.f32 %v1647_v12 }
0x19ab   :  { %vm1207_vm8 = vmor %vm1205_vm7, %vm1206_vm6 }
0x19ac   :  { %v1202_v17 = vsub.f32 1.0, %v1201_v4 }
0x19ae   :  { %v1203_v14 = vmul.f32 %v1647_v12, %v1202_v17 }
0x19b0   :  { %v1204_v15 = vadd.f32 %v1647_v12, %v1203_v14 }
0x19b2   :  { %v1208_v21 = vsel %vm1207_vm8, %v1647_v12, %v1204_v15 }
0x19b3   :  { %v1213_v24 = vsel %vm1210_vm9, %v1212_v22, %v1208_v21 }
0x19b4   :  { %v1227_v19 = vsub.f32 1.0, %v1213_v24  ;;  %v1233_v42 = vmul.f32 %v1213_v24, %v1149_v35 }
0x1a0a   :  { %v1218_v23 = vpop.permute.xlu1 %1217 }
0x1a0b   :  { %v1220_v25 = vmul.f32 %v1218_v23, %v1213_v24 }
0x1a0d   :  { %1222 = vrot.lane.b32.xlu2 %v1220_v25, %s1695_s21 }
0x1a67   :  { %v1223_v26 = vpop.permute.xlu2 %1222 }
0x1a68   :  { %v1225_v62 = vadd.f32 %v1223_v26, %v1168_v9 }
0x1a6a   :  { %1648 = vtanh.f32 %v1225_v62 }
0x1a6b   :  { %1650 = vpow2.f32 %v1519_v38 }
0x1a70   :  { %v1649_v32 = vpop.eup %1648 }
0x1a71   :  { %1229 = vrot.lane.b32.xlu0 %v1649_v32, %s1696_s1  ;;  %v1651_v33 = vpop.eup %1650 }
0x1a72   :  { %v673_v1 = vadd.f32 1.0, %v1651_v33 }
0x1a74   :  { %1652 = vrcp.f32 %v673_v1  ;;  %v685_v55 = vand.u32 2147483648, %v673_v1  ;;  %vm679_vm11 = vweird.f32 %v673_v1  ;;  %v683_v56 = vand.u32 2147483647, %v673_v1 }
0x1a76   :  { %v686_v31 = vor.u32 1.1754944e-38, %v685_v55  ;;  %vm684_vm13 = vcmp.eq.f32.partialorder %v683_v56, 8.507059e+37 }
0x1a79   :  { %691 = vrot.lane.b32.xlu0 %v689_v51, %s1695_s21 }
0x1a7a   :  { %v1653_v48 = vpop.eup %1652 }
0x1a7b   :  { %v675_v49 = vmul.f32 %v1653_v48, %v673_v1  ;;  %vm680_vm10 = vweird.f32 %v1653_v48 }
0x1a7c   :  { %vm681_vm12 = vmor %vm679_vm11, %vm680_vm10 }
0x1a7d   :  { %v676_v50 = vsub.f32 1.0, %v675_v49 }
0x1a7f   :  { %v677_v28 = vmul.f32 %v1653_v48, %v676_v50 }
0x1a81   :  { %v678_v54 = vadd.f32 %v1653_v48, %v677_v28 }
0x1a83   :  { %v682_v53 = vsel %vm681_vm12, %v1653_v48, %v678_v54 }
0x1a84   :  { %v687_v58 = vsel %vm684_vm13, %v686_v31, %v682_v53 }
0x1a85   :  { %v701_v24 = vsub.f32 1.0, %v687_v58  ;;  %v707_v26 = vmul.f32 %v687_v58, %v2093_v46 }
0x1ae3   :  { %v1230_v63 = vpop.permute.xlu0 %1229 }
0x1ae4   :  { %v1232_v0 = vmul.f32 %v1230_v63, %v1227_v19 }
0x1ae6   :  { %v2255_v43 = vadd.f32 %v1233_v42, %v1232_v0 }
0x1ae8   :  { %1256 = vrot.lane.b32.xlu1 %v2255_v43, %s1696_s1 }
0x1aeb   :  { %v692_v57 = vpop.permute.xlu0 %691 }
0x1aec   :  { %v694_v60 = vmul.f32 %v692_v57, %v687_v58 }
0x1b5a   :  { %v1257_v45 = vpop.permute.xlu1 %1256 }
0x1b5b   :  { %1540 = vmatmul.msk.f32.vlgmr.msra.gmra.mxu2 %vm150_vm1, %v1257_v45 }
0x1b63   :  { %1548 = vmatmul.msk.f32.vlgmr.msrb.gmra.mxu2 %vm150_vm1, %v2197_v2 }
0x1b6b   :  { %1549 = vmatmul.msk.f32.gmra.mxu2 %vm150_vm1, %v1172_v6 }
0x1b73   :  { %1550 = vmatmul.msk.f32.gmra.mxu2 %vm150_vm1, %v1257_v45 }
0x1bde   :  { %v1277_v52 = vpop.f32.mrf.mxu2 }
0x1bdf   :  { %v1300_v2 = vadd.f32 %v1277_v52, %v2074_v44  ;;  %v1280_v5 = vadd.f32 %v1277_v52, %v1253_v30 }
0x1be1   :  { %1302 = vrot.lane.b32.xlu2 %v1300_v2, %s1695_s21  ;;  %v1541_v35 = vmul.f32 -1.442695, %v1280_v5 }
0x1be3   :  { %1654 = vpow2.f32 %v1541_v35 }
0x1be6   :  { %v1449_v59 = vpop.f32.mrf.mxu2 }
0x1be7   :  { %v1450_v61 = vadd.f32 %v2220_v27, %v1449_v59 }
0x1be9   :  { %1468 = vst.msk [vmem:[%s2333_s14 + $0x18] sm:$0xff] %vm1464_vm0, %v1450_v61  ;;  %696 = vrot.lane.b32.xlu2 %v694_v60, %s1695_s21  ;;  %v1655_v6 = vpop.eup %1654 }
0x1bea   :  { %v1284_v7 = vadd.f32 1.0, %v1655_v6 }
0x1bec   :  { %1656 = vrcp.f32 %v1284_v7  ;;  %v1296_v11 = vand.u32 2147483648, %v1284_v7  ;;  %vm1290_vm15 = vweird.f32 %v1284_v7  ;;  %v1294_v16 = vand.u32 2147483647, %v1284_v7 }
0x1bee   :  { %v1452_v3 = vpop.f32.mrf.mxu2  ;;  %v1297_v4 = vor.u32 1.1754944e-38, %v1296_v11  ;;  %vm1295_vm3 = vcmp.eq.f32.partialorder %v1294_v16, 8.507059e+37 }
0x1bef   :  { %v1453_v34 = vadd.f32 %v2220_v27, %v1452_v3 }
0x1bf1   :  { %1469 = vst.msk [vmem:[%s2333_s14 + $0x20] sm:$0xff] %vm1464_vm0, %v1453_v34 }
0x1bf2   :  { %v1657_v41 = vpop.eup %1656 }
0x1bf3   :  { %v1286_v8 = vmul.f32 %v1657_v41, %v1284_v7  ;;  %vm1291_vm14 = vweird.f32 %v1657_v41 }
0x1bf4   :  { %vm1292_vm2 = vmor %vm1290_vm15, %vm1291_vm14 }
0x1bf5   :  { %v1287_v9 = vsub.f32 1.0, %v1286_v8 }
0x1bf6   :  { %v1455_v29 = vpop.f32.mrf.mxu2 }
0x1bf7   :  { %v1456_v37 = vadd.f32 %v2220_v27, %v1455_v29  ;;  %v1288_v10 = vmul.f32 %v1657_v41, %v1287_v9 }
0x1bf9   :  { %1470 = vst.msk [vmem:[%s2333_s14 + $0x28] sm:$0xff] %vm1464_vm0, %v1456_v37  ;;  %v1289_v13 = vadd.f32 %v1657_v41, %v1288_v10 }
0x1bfb   :  { %v1293_v12 = vsel %vm1292_vm2, %v1657_v41, %v1289_v13 }
0x1bfc   :  { %v1298_v17 = vsel %vm1295_vm3, %v1297_v4, %v1293_v12 }
0x1bfd   :  { %v1312_v51 = vsub.f32 1.0, %v1298_v17  ;;  %v1318_v19 = vmul.f32 %v1298_v17, %v2255_v43 }
0x1c3b   :  { %v1303_v36 = vpop.permute.xlu2 %1302 }
0x1c3c   :  { %v1305_v14 = vmul.f32 %v1303_v36, %v1298_v17 }
0x1c3e   :  { %1307 = vrot.lane.b32.xlu1 %v1305_v14, %s1695_s21 }
0x1c43   :  { %v697_v15 = vpop.permute.xlu2 %696 }
0x1c44   :  { %v699_v18 = vadd.f32 %v697_v15, %v1906_v39 }
0x1c46   :  { %1658 = vtanh.f32 %v699_v18 }
0x1c4c   :  { %v1659_v20 = vpop.eup %1658 }
0x1c4d   :  { %703 = vrot.lane.b32.xlu1 %v1659_v20, %s1696_s1 }
0x1cb0   :  { %v1308_v21 = vpop.permute.xlu1 %1307 }
0x1cb1   :  { %v1310_v22 = vadd.f32 %v1308_v21, %v1253_v30 }
0x1cb3   :  { %1660 = vtanh.f32 %v1310_v22 }
0x1cb9   :  { %v1661_v23 = vpop.eup %1660 }
0x1cba   :  { %1314 = vrot.lane.b32.xlu0 %v1661_v23, %s1696_s1 }
0x1cbf   :  { %v704_v25 = vpop.permute.xlu1 %703 }
0x1cc0   :  { %v706_v62 = vmul.f32 %v704_v25, %v701_v24 }
0x1cc2   :  { %v708_v32 = vadd.f32 %v707_v26, %v706_v62 }
0x1cc4   :  { %710 = vrot.lane.b32.xlu0 %v708_v32, %s1696_s1 }
0x1d2c   :  { %v1315_v39 = vpop.permute.xlu0 %1314 }
0x1d2d   :  { %v1317_v63 = vmul.f32 %v1315_v39, %v1312_v51 }
0x1d2f   :  { %v1319_v42 = vadd.f32 %v1318_v19, %v1317_v63 }
0x1d31   :  { %1343 = vrot.lane.b32.xlu2 %v1319_v42, %s1696_s1 }
0x1d36   :  { %v711_v0 = vpop.permute.xlu0 %710 }
0x1d37   :  { %713 = vst.msk [vmem:[#allocation2] sm:$0xff] %vm150_vm1, %v711_v0  ;;  %1542 = vmatmul.msk.f32.vlgmr.msrb.gmra.mxu3 %vm150_vm1, %v711_v0 }
0x1d8b   :  { %v1344_v45 = vpop.permute.xlu2 %1343 }
0x1d8c   :  { %1543 = vmatmul.msk.f32.vlgmr.msrb.gmra.mxu0 %vm150_vm1, %v1344_v45  ;;  %1551 = vmatmul.msk.f32.vlgmr.msra.gmra.mxu3 %vm150_vm1, %v1344_v45 }
0x1dba   :  { %v1339_v46 = vpop.f32.mrf.mxu3 }
0x1dbb   :  { %v1340_v1 = vadd.f32 %v2082_v47, %v1339_v46 }
0x1e09   :  { %v1364_v40 = vpop.f32.mrf.mxu0 }
0x1e0a   :  { %v1387_v38 = vadd.f32 %v1364_v40, %v2074_v44  ;;  %v1367_v48 = vadd.f32 %v1364_v40, %v1340_v1 }
0x1e0c   :  { %1389 = vrot.lane.b32.xlu1 %v1387_v38, %s1695_s21  ;;  %v1544_v49 = vmul.f32 -1.442695, %v1367_v48 }
0x1e0e   :  { %1662 = vpow2.f32 %v1544_v49 }
0x1e0f   :  { %v1458_v43 = vpop.f32.mrf.mxu3 }
0x1e10   :  { %v1459_v33 = vadd.f32 %v2220_v27, %v1458_v43 }
0x1e12   :  { %1471 = vst.msk [vmem:[%s2333_s14 + $0x30] sm:$0xff] %vm1464_vm0, %v1459_v33 }
0x1e14   :  { %v1663_v50 = vpop.eup %1662 }
0x1e15   :  { %v1371_v28 = vadd.f32 1.0, %v1663_v50 }
0x1e17   :  { %1664 = vrcp.f32 %v1371_v28  ;;  %v1383_v56 = vand.u32 2147483648, %v1371_v28  ;;  %vm1377_vm5 = vweird.f32 %v1371_v28  ;;  %v1381_v53 = vand.u32 2147483647, %v1371_v28 }
0x1e19   :  { %v1384_v57 = vor.u32 1.1754944e-38, %v1383_v56  ;;  %vm1382_vm7 = vcmp.eq.f32.partialorder %v1381_v53, 8.507059e+37 }
0x1e1d   :  { %v1665_v52 = vpop.eup %1664 }
0x1e1e   :  { %v1373_v44 = vmul.f32 %v1665_v52, %v1371_v28  ;;  %vm1378_vm4 = vweird.f32 %v1665_v52 }
0x1e1f   :  { %vm1379_vm6 = vmor %vm1377_vm5, %vm1378_vm4 }
0x1e20   :  { %v1374_v54 = vsub.f32 1.0, %v1373_v44 }
0x1e22   :  { %v1375_v2 = vmul.f32 %v1665_v52, %v1374_v54 }
0x1e24   :  { %v1376_v55 = vadd.f32 %v1665_v52, %v1375_v2 }
0x1e26   :  { %v1380_v31 = vsel %vm1379_vm6, %v1665_v52, %v1376_v55 }
0x1e27   :  { %v1385_v58 = vsel %vm1382_vm7, %v1384_v57, %v1380_v31 }
0x1e28   :  { %v1399_v34 = vsub.f32 1.0, %v1385_v58  ;;  %v1405_v37 = vmul.f32 %v1385_v58, %v1319_v42 }
0x1e7e   :  { %v1390_v47 = vpop.permute.xlu1 %1389 }
0x1e7f   :  { %v1392_v59 = vmul.f32 %v1390_v47, %v1385_v58 }
0x1e81   :  { %1394 = vrot.lane.b32.xlu2 %v1392_v59, %s1695_s21  ;;  %s1479_s21 = sshll.u32 %s1697_s0, 4  ;;  %s1480_s21 = int_to_ptr.vmem [resolvable:$true] %s1479_s21 }
0x1edb   :  { %v1395_v60 = vpop.permute.xlu2 %1394 }
0x1edc   :  { %v1397_v61 = vadd.f32 %v1395_v60, %v1340_v1 }
0x1ede   :  { %1666 = vtanh.f32 %v1397_v61 }
0x1ee4   :  { %v1667_v3 = vpop.eup %1666 }
0x1ee5   :  { %1401 = vrot.lane.b32.xlu0 %v1667_v3, %s1696_s1 }
0x1f57   :  { %v1402_v29 = vpop.permute.xlu0 %1401 }
0x1f58   :  { %v1404_v30 = vmul.f32 %v1402_v29, %v1399_v34 }
0x1f5a   :  { %v1406_v5 = vadd.f32 %v1405_v37, %v1404_v30 }
0x1f5c   :  { %1408 = vrot.lane.b32.xlu1 %v1406_v5, %s1696_s1 }
0x1fce   :  { %v1409_v35 = vpop.permute.xlu1 %1408 }
0x1fcf   :  { %1412 = vst.msk [vmem:[#allocation2 + $0x8] sm:$0xff] %vm150_vm1, %v1409_v35  ;;  %1552 = vmatmul.msk.f32.gmra.mxu3 %vm150_vm1, %v1409_v35 }
0x1fd0   :  { %1487 = dma.vmem_to_hbm [thread:$0]  %s1480_s21, 256, %s1482_s10, [#allocation3], %s1698_s30, %s1698_s30, %s1699_s4  }
0x2052   :  { %v1461_v6 = vpop.f32.mrf.mxu3 }
0x2053   :  { %v1462_v7 = vadd.f32 %v2220_v27, %v1461_v6 }
0x2055   :  { %1472 = vst.msk [vmem:[%s2333_s14 + $0x38] sm:$0xff] %vm1464_vm0, %v1462_v7 }
0x2056   :  { %1692 = dma.done.wait [#allocation3], 256  }
0x2057   :  { %1693 = vsyncadd [#allocation3], 4294967040 }
0x2058   :  { %1494 = vsyncpa [#allocation3], 1 }

</bundles_post_ra>
